<compile_context>
chip_gen: v5e
topology: v5e:2x2
jax: 0.10.0
libtpu: 0.0.40
codegen_flags: <defaults>
</compile_context>

<pallas_src>
import functools

import jax
import jax.numpy as jnp
from jax.experimental import pallas as pl
from jax.experimental.pallas import tpu as pltpu

EPS_LN = 1e-5          # torch.nn.LayerNorm default eps
NEG_INF = -1e30        # additive key-padding mask value


def _round_up(n, m):
    return ((n + m - 1) // m) * m


def _vmem_limit_bytes():
    # v5e/v6e have 128 MiB physical VMEM -> ~96 MiB scoped limit leaves room for
    # larger batch blocks / deeper buffering; v7x only has 64 MiB -> ~48 MiB.
    try:
        cap = pltpu.get_tpu_info().vmem_capacity_bytes
    except Exception:
        cap = 64 << 20
    return int(min(cap * 3 // 4, 100 << 20))


def _pick_batch_block(batch, d_model):
    # Batch-block the transformer grid so per-step weight DMA is amortized over
    # several images.  Narrower models get bB=4; very wide ones bB=2 (VMEM).
    target = 2 if d_model > 896 else 4
    bb = 1
    for cand in range(1, min(batch, target) + 1):
        if batch % cand == 0:
            bb = cand
    return bb


# ---------------------------------------------------------------------------
# In-kernel helpers
# ---------------------------------------------------------------------------
def _layernorm(x, w, b):
    # f32 statistics, biased variance, eps=1e-5 (matches F.layer_norm)
    mu = jnp.mean(x, axis=-1, keepdims=True)
    var = jnp.mean(jnp.square(x - mu), axis=-1, keepdims=True)
    return (x - mu) * jax.lax.rsqrt(var + EPS_LN) * w + b


# ---------------------------------------------------------------------------
# Pallas kernels
# ---------------------------------------------------------------------------
def preamble_kernel(patch_ref, wconv_ref, cls_ref, pos_ref, lnw_ref, lnb_ref, o_ref,
                    *, seq_len, seq_pad):
    # Fused: conv1-as-matmul + class token + positional embedding + ln_pre.
    # Rows are written directly into the padded output block (no concatenate).
    lnw = lnw_ref[...]
    lnb = lnb_ref[...]
    emb = jnp.dot(patch_ref[0], wconv_ref[...],
                  preferred_element_type=jnp.float32)                    # (Lp, D) f32
    o_ref[0, 0:1, :] = _layernorm(cls_ref[...] + pos_ref[0:1, :], lnw, lnb)
    o_ref[0, 1:seq_len, :] = _layernorm(emb + pos_ref[1:seq_len, :], lnw, lnb)
    if seq_pad > seq_len:
        o_ref[0, seq_len:seq_pad, :] = jnp.zeros(
            (seq_pad - seq_len, o_ref.shape[2]), jnp.float32)


def resblock_kernel(x_ref, ln1w_ref, ln1b_ref, win_ref, bin_ref, wout_ref, bout_ref,
                    ln2w_ref, ln2b_ref, wfc_ref, bfc_ref, wpr_ref, bpr_ref,
                    o_ref, *, n_head, seq_len):
    # grid = (B // bB, layers).  The (bB, Lpad, D) activation block is resident in
    # the output buffer across the layer axis; stacked per-layer weights stream in
    # (bf16, double-buffered => layer l+1 prefetches while layer l computes).
    layer = pl.program_id(1)

    @pl.when(layer == 0)
    def _():
        o_ref[...] = x_ref[...]          # bring activations in once per batch block

    x = o_ref[...]                        # (bB, Lpad, D) f32 residual stream
    b_blk, lpad, d_model = x.shape
    d_head = d_model // n_head
    padded = lpad > seq_len

    # --- multi-head self attention (nn.MultiheadAttention, no mask) -----------
    x2 = x.reshape(b_blk * lpad, d_model)
    xn = _layernorm(x2, ln1w_ref[0], ln1b_ref[0]).astype(jnp.bfloat16)
    # 1/sqrt(d_head) is pre-folded into the query columns of w_in / b_in.
    qkv = (jnp.dot(xn, win_ref[0], preferred_element_type=jnp.float32)
           + bin_ref[0]).astype(jnp.bfloat16)                            # (bB*Lpad, 3D)

    if padded:
        key_bias = jnp.where(
            jax.lax.broadcasted_iota(jnp.int32, (1, lpad), 1) < seq_len,
            0.0, NEG_INF)                  # (1, Lpad) additive mask, built once

    for b in range(b_blk):                 # bB is small (<= 4): static loop
        base = b * lpad
        q_b = qkv[base:base + lpad, 0:d_model]
        k_b = qkv[base:base + lpad, d_model:2 * d_model]
        v_b = qkv[base:base + lpad, 2 * d_model:3 * d_model]
        acc = jnp.zeros((lpad, d_model), jnp.float32)
        for h in range(n_head):
            sl = slice(h * d_head, (h + 1) * d_head)
            s = jax.lax.dot_general(q_b[:, sl], k_b[:, sl],
                                    (((1,), (1,)), ((), ())),
                                    preferred_element_type=jnp.float32)  # (Lpad, Lpad)
            if padded:
                s = s + key_bias
            s = s - jnp.max(s, axis=-1, keepdims=True)
            e = jnp.exp(s)
            p = (e * pl.reciprocal(jnp.sum(e, axis=-1, keepdims=True),
                                   approx=True)).astype(jnp.bfloat16)
            o_h = jnp.dot(p, v_b[:, sl],
                          preferred_element_type=jnp.float32).astype(jnp.bfloat16)
            # Fold the out-projection into the head loop: per-head (Lpad, d_head)
            # output hits its d_head rows of w_out immediately and accumulates in
            # f32 -- no (Lpad, D) assembly buffer, no 64-lane masked stores.
            acc = acc + jnp.dot(o_h, wout_ref[0, sl, :],
                                preferred_element_type=jnp.float32)
        o_ref[b] = x[b] + acc + bout_ref[0]

    # --- MLP with QuickGELU (hard-coded in ResidualAttentionBlock) ------------
    xm = o_ref[...].reshape(b_blk * lpad, d_model)        # post-attention residual
    xn2 = _layernorm(xm, ln2w_ref[0], ln2b_ref[0]).astype(jnp.bfloat16)
    h1 = jnp.dot(xn2, wfc_ref[0], preferred_element_type=jnp.float32) + bfc_ref[0]
    h1 = (h1 * jax.nn.sigmoid(1.702 * h1)).astype(jnp.bfloat16)
    mlp = jnp.dot(h1, wpr_ref[0], preferred_element_type=jnp.float32) + bpr_ref[0]
    out = (xm + mlp).reshape(b_blk, lpad, d_model)

    if padded:
        # Keep padded rows exactly zero every layer so they can never drift to
        # Inf/NaN and leak into valid rows through the p @ v matmul.
        row_valid = (jax.lax.broadcasted_iota(jnp.int32, (lpad, 1), 0)
                     < seq_len).astype(jnp.float32)
        out = out * row_valid
    o_ref[...] = out
    # TODO(synk): v7x-specific chunked streaming of w_fc/w_pr (extra grid axis or
    #             pltpu.emit_pipeline over the 4*D hidden dim) and Buffered(3) on
    #             the big weight specs for v6e are target-tuning knobs not applied
    #             in this generic version.


def head_kernel(x_ref, lnw_ref, lnb_ref, proj_ref, o_ref):
    # CLS tokens: ln_post -> @ proj (bf16 MXU) -> F.normalize(dim=-1) via rsqrt.
    xn = _layernorm(x_ref[...], lnw_ref[...], lnb_ref[...]).astype(jnp.bfloat16)
    y = jnp.dot(xn, proj_ref[...], preferred_element_type=jnp.float32)
    inv = jax.lax.rsqrt(jnp.maximum(jnp.sum(y * y, axis=-1, keepdims=True), 1e-24))
    o_ref[...] = y * inv


# ---------------------------------------------------------------------------
# Wrappers (pallas_call plumbing)
# ---------------------------------------------------------------------------
def vit_forward(x, params, cfg):
    B, C, Himg, Wimg = x.shape
    P = cfg['patch_size']
    D = cfg['width']
    E = cfg['embed_dim']
    H = cfg['heads']
    nl = cfg['layers']
    Hp, Wp = Himg // P, Wimg // P
    Lp = Hp * Wp
    Din = C * P * P
    L = Lp + 1
    Lpad = _round_up(L, 8)          # sublane-aligned; no need to pad to 128
    bB = _pick_batch_block(B, D)
    vmem_limit = _vmem_limit_bytes()

    # --- glue: non-overlapping patches flattened in (C, ph, pw) order, bf16 ---
    patches = (x.reshape(B, C, Hp, P, Wp, P)
                 .transpose(0, 2, 4, 1, 3, 5)
                 .reshape(B, Lp, Din)
                 .astype(jnp.bfloat16))

    # --- fused preamble: conv1 + cls token + pos emb + ln_pre (grid over batch) ---
    xseq = pl.pallas_call(
        functools.partial(preamble_kernel, seq_len=L, seq_pad=Lpad),
        out_shape=jax.ShapeDtypeStruct((B, Lpad, D), jnp.float32),
        grid=(B,),
        in_specs=[
            pl.BlockSpec((1, Lp, Din), lambda b: (b, 0, 0)),
            pl.BlockSpec((Din, D), lambda b: (0, 0)),
            pl.BlockSpec((1, D), lambda b: (0, 0)),
            pl.BlockSpec((L, D), lambda b: (0, 0)),
            pl.BlockSpec((1, D), lambda b: (0, 0)),
            pl.BlockSpec((1, D), lambda b: (0, 0)),
        ],
        out_specs=pl.BlockSpec((1, Lpad, D), lambda b: (b, 0, 0)),
        compiler_params=pltpu.CompilerParams(
            dimension_semantics=("parallel",), vmem_limit_bytes=vmem_limit),
    )(patches, params['conv_w_T'], params['class_embedding'],
      params['positional_embedding'], params['ln_pre_w'], params['ln_pre_b'])

    # --- transformer: single pallas_call, grid=(batch blocks, layers) ---------
    blk = params['blocks']
    xmap = lambda i, l: (i, 0, 0)     # noqa: E731
    wmap = lambda i, l: (l, 0, 0)     # noqa: E731
    xseq = pl.pallas_call(
        functools.partial(resblock_kernel, n_head=H, seq_len=L),
        out_shape=jax.ShapeDtypeStruct((B, Lpad, D), jnp.float32),
        grid=(B // bB, nl),
        in_specs=[
            pl.BlockSpec((bB, Lpad, D), xmap),
            pl.BlockSpec((1, 1, D), wmap),          # ln1_w
            pl.BlockSpec((1, 1, D), wmap),          # ln1_b
            pl.BlockSpec((1, D, 3 * D), wmap),      # w_in  (bf16, q-scale folded)
            pl.BlockSpec((1, 1, 3 * D), wmap),      # b_in
            pl.BlockSpec((1, D, D), wmap),          # w_out (bf16)
            pl.BlockSpec((1, 1, D), wmap),          # b_out
            pl.BlockSpec((1, 1, D), wmap),          # ln2_w
            pl.BlockSpec((1, 1, D), wmap),          # ln2_b
            pl.BlockSpec((1, D, 4 * D), wmap),      # w_fc  (bf16)
            pl.BlockSpec((1, 1, 4 * D), wmap),      # b_fc
            pl.BlockSpec((1, 4 * D, D), wmap),      # w_proj (bf16)
            pl.BlockSpec((1, 1, D), wmap),          # b_proj
        ],
        out_specs=pl.BlockSpec((bB, Lpad, D), xmap),
        input_output_aliases={0: 0},                # residual stream updated in place
        compiler_params=pltpu.CompilerParams(
            dimension_semantics=("parallel", "arbitrary"),
            vmem_limit_bytes=vmem_limit),
    )(xseq, blk['ln1_w'], blk['ln1_b'], blk['w_in'], blk['b_in'],
      blk['w_out'], blk['b_out'], blk['ln2_w'], blk['ln2_b'],
      blk['w_fc'], blk['b_fc'], blk['w_pr'], blk['b_pr'])

    # --- ln_post on CLS + projection + L2 normalize ---------------------------
    cls_tok = xseq[:, 0, :]                               # (B, D) glue slice
    out = pl.pallas_call(
        head_kernel,
        out_shape=jax.ShapeDtypeStruct((B, E), jnp.float32),
        grid=(1,),
        in_specs=[pl.BlockSpec((B, D), lambda i: (0, 0)),
                  pl.BlockSpec((1, D), lambda i: (0, 0)),
                  pl.BlockSpec((1, D), lambda i: (0, 0)),
                  pl.BlockSpec((D, E), lambda i: (0, 0))],
        out_specs=pl.BlockSpec((B, E), lambda i: (0, 0)),
        compiler_params=pltpu.CompilerParams(vmem_limit_bytes=vmem_limit),
    )(cls_tok, params['ln_post_w'], params['ln_post_b'], params['proj'])
    return out


# ---------------------------------------------------------------------------
# Deterministic parameter init (shapes follow the PyTorch module's __init__).
# Weights stored pre-transposed (in, out), stacked over layers, cast to bf16;
# the d_head^-0.5 attention scale is folded into the query part of in_proj.
# ---------------------------------------------------------------------------
def init_params(key, cfg):
    D = cfg['width']
    E = cfg['embed_dim']
    P = cfg['patch_size']
    C = 3
    nl = cfg['layers']
    H = cfg['heads']
    Lp = (cfg['image_size'] // P) ** 2
    L = Lp + 1
    Din = C * P * P
    scale = D ** -0.5
    q_scale = (D // H) ** -0.5

    def normal(k, shape, s=0.02):
        return s * jax.random.normal(k, shape, dtype=jnp.float32)

    keys = jax.random.split(key, 4 + 8 * nl)
    ki = iter(keys)

    conv_w = normal(next(ki), (D, C, P, P))               # nn.Conv2d weight (out,in,kh,kw)
    params = {
        'conv_w_T': conv_w.reshape(D, Din).T.astype(jnp.bfloat16),       # (Din, D)
        'class_embedding': (scale * jax.random.normal(next(ki), (D,), dtype=jnp.float32)
                            ).reshape(1, D),
        'positional_embedding': scale * jax.random.normal(next(ki), (L, D), dtype=jnp.float32),
        'ln_pre_w': jnp.ones((1, D), jnp.float32), 'ln_pre_b': jnp.zeros((1, D), jnp.float32),
        'ln_post_w': jnp.ones((1, D), jnp.float32), 'ln_post_b': jnp.zeros((1, D), jnp.float32),
        'proj': (scale * jax.random.normal(next(ki), (D, E), dtype=jnp.float32)
                 ).astype(jnp.bfloat16),
    }

    names = ('ln1_w', 'ln1_b', 'w_in', 'b_in', 'w_out', 'b_out',
             'ln2_w', 'ln2_b', 'w_fc', 'b_fc', 'w_pr', 'b_pr')
    lists = {n: [] for n in names}
    for _ in range(nl):
        # nn.MultiheadAttention in_proj (3D, D) / out_proj (D, D); nn.Linear stores (out, in).
        w_in = normal(next(ki), (3 * D, D)); b_in = normal(next(ki), (3 * D,))
        # fold 1/sqrt(d_head) into the query rows (semantically identical forward).
        w_in = w_in.at[:D, :].multiply(q_scale)
        b_in = b_in.at[:D].multiply(q_scale)
        w_out = normal(next(ki), (D, D));    b_out = normal(next(ki), (D,))
        w_fc = normal(next(ki), (4 * D, D)); b_fc = normal(next(ki), (4 * D,))
        w_pr = normal(next(ki), (D, 4 * D)); b_pr = normal(next(ki), (D,))
        lists['ln1_w'].append(jnp.ones((1, D), jnp.float32))
        lists['ln1_b'].append(jnp.zeros((1, D), jnp.float32))
        lists['w_in'].append(w_in.T.astype(jnp.bfloat16))
        lists['b_in'].append(b_in.reshape(1, 3 * D))
        lists['w_out'].append(w_out.T.astype(jnp.bfloat16))
        lists['b_out'].append(b_out.reshape(1, D))
        lists['ln2_w'].append(jnp.ones((1, D), jnp.float32))
        lists['ln2_b'].append(jnp.zeros((1, D), jnp.float32))
        lists['w_fc'].append(w_fc.T.astype(jnp.bfloat16))
        lists['b_fc'].append(b_fc.reshape(1, 4 * D))
        lists['w_pr'].append(w_pr.T.astype(jnp.bfloat16))
        lists['b_pr'].append(b_pr.reshape(1, D))
    params['blocks'] = {n: jnp.stack(v) for n, v in lists.items()}
    return params


# TODO(synk): timm_model_name branch (TimmModel), grad-checkpointing toggles and the
#             unused attn_mask plumbing are training/config paths with no effect on
#             this forward pass; not translated.

if __name__ == "__main__":
    # Small config consistent with the module: width divisible by head width,
    # image_size divisible by patch_size, mlp_ratio fixed at 4 inside the block.
    cfg = dict(image_size=32, patch_size=16, width=64, heads=2, layers=2, embed_dim=32)

    key = jax.random.PRNGKey(0)
    pkey, xkey = jax.random.split(key)
    params = init_params(pkey, cfg)

    x = jax.random.normal(xkey, (2, 3, cfg['image_size'], cfg['image_size']), dtype=jnp.float32)

    fwd = jax.jit(lambda img, p: vit_forward(img, p, cfg))
    out = jax.block_until_ready(fwd(x, params))

    assert out.shape == (2, cfg['embed_dim'])
    assert bool(jnp.all(jnp.isfinite(out)))
    # F.normalize: output rows have unit L2 norm.
    norms = jnp.sqrt(jnp.sum(out * out, axis=-1))
    assert bool(jnp.allclose(norms, 1.0, atol=1e-4))
    print("KERNEL_OK")
</pallas_src>

<mosaic_0001>
module attributes {stable_mosaic.version = 11 : i64} {
  func.func @preamble_kernel(%arg0: i32, %arg1: memref<1x4x768xbf16, #tpu.memory_space<vmem>>, %arg2: memref<768x64xbf16, #tpu.memory_space<vmem>>, %arg3: memref<1x64xf32, #tpu.memory_space<vmem>>, %arg4: memref<5x64xf32, #tpu.memory_space<vmem>>, %arg5: memref<1x64xf32, #tpu.memory_space<vmem>>, %arg6: memref<1x64xf32, #tpu.memory_space<vmem>>, %arg7: memref<1x8x64xf32, #tpu.memory_space<vmem>>) attributes {dimension_semantics = [#tpu.dimension_semantics<parallel>], iteration_bounds = array<i64: 2>, scalar_prefetch = 0 : i64, scratch_operands = 0 : i64, tpu.core_type = #tpu.core_type<tc>, window_params = [{transform_indices = @transform_0, window_bounds = array<i64: 1, 4, 768>}, {pipeline_mode = #tpu.pipeline_mode<synchronous>, transform_indices = @transform_1, window_bounds = array<i64: 768, 64>}, {pipeline_mode = #tpu.pipeline_mode<synchronous>, transform_indices = @transform_2, window_bounds = array<i64: 1, 64>}, {pipeline_mode = #tpu.pipeline_mode<synchronous>, transform_indices = @transform_3, window_bounds = array<i64: 5, 64>}, {pipeline_mode = #tpu.pipeline_mode<synchronous>, transform_indices = @transform_4, window_bounds = array<i64: 1, 64>}, {pipeline_mode = #tpu.pipeline_mode<synchronous>, transform_indices = @transform_5, window_bounds = array<i64: 1, 64>}, {transform_indices = @transform_6, window_bounds = array<i64: 1, 8, 64>}]} {
    %c0 = arith.constant 0 : index
    %c0_0 = arith.constant 0 : index
    %0 = vector.load %arg5[%c0, %c0_0] : memref<1x64xf32, #tpu.memory_space<vmem>>, vector<1x64xf32>
    %c0_1 = arith.constant 0 : index
    %c0_2 = arith.constant 0 : index
    %1 = vector.load %arg6[%c0_1, %c0_2] : memref<1x64xf32, #tpu.memory_space<vmem>>, vector<1x64xf32>
    %c0_3 = arith.constant 0 : index
    %c0_4 = arith.constant 0 : index
    %c0_5 = arith.constant 0 : index
    %2 = vector.load %arg1[%c0_3, %c0_4, %c0_5] : memref<1x4x768xbf16, #tpu.memory_space<vmem>>, vector<1x4x768xbf16>
    %3 = vector.shape_cast %2 : vector<1x4x768xbf16> to vector<4x768xbf16>
    %c0_6 = arith.constant 0 : index
    %c0_7 = arith.constant 0 : index
    %4 = vector.load %arg2[%c0_6, %c0_7] : memref<768x64xbf16, #tpu.memory_space<vmem>>, vector<768x64xbf16>
    %cst = arith.constant dense<0.000000e+00> : vector<4x64xf32>
    %5 = tpu.matmul %3, %4, %cst {dimension_numbers = #tpu.dot_dimension_numbers<[1], [0], [0], [1], [0, 0, 1, 1], [], []>} : vector<4x768xbf16>, vector<768x64xbf16>, vector<4x64xf32> -> vector<4x64xf32>
    %c0_8 = arith.constant 0 : index
    %c0_9 = arith.constant 0 : index
    %6 = vector.load %arg3[%c0_8, %c0_9] : memref<1x64xf32, #tpu.memory_space<vmem>>, vector<1x64xf32>
    %c0_10 = arith.constant 0 : index
    %c0_11 = arith.constant 0 : index
    %7 = vector.load %arg4[%c0_10, %c0_11] : memref<5x64xf32, #tpu.memory_space<vmem>>, vector<1x64xf32>
    %8 = arith.addf %6, %7 : vector<1x64xf32>
    %cst_12 = arith.constant dense<0.000000e+00> : vector<1xf32>
    %9 = vector.multi_reduction <add>, %8, %cst_12 [1] : vector<1x64xf32> to vector<1xf32>
    %10 = vector.shape_cast %9 : vector<1xf32> to vector<1x1xf32>
    %cst_13 = arith.constant 6.400000e+01 : f32
    %11 = vector.broadcast %cst_13 : f32 to vector<1x1xf32>
    %12 = arith.divf %10, %11 : vector<1x1xf32>
    %13 = vector.broadcast %12 : vector<1x1xf32> to vector<1x64xf32>
    %14 = arith.subf %8, %13 : vector<1x64xf32>
    %15 = arith.mulf %14, %14 : vector<1x64xf32>
    %cst_14 = arith.constant dense<0.000000e+00> : vector<1xf32>
    %16 = vector.multi_reduction <add>, %15, %cst_14 [1] : vector<1x64xf32> to vector<1xf32>
    %17 = vector.shape_cast %16 : vector<1xf32> to vector<1x1xf32>
    %cst_15 = arith.constant 6.400000e+01 : f32
    %18 = vector.broadcast %cst_15 : f32 to vector<1x1xf32>
    %19 = arith.divf %17, %18 : vector<1x1xf32>
    %20 = vector.broadcast %12 : vector<1x1xf32> to vector<1x64xf32>
    %21 = arith.subf %8, %20 : vector<1x64xf32>
    %cst_16 = arith.constant 9.99999974E-6 : f32
    %22 = vector.broadcast %cst_16 : f32 to vector<1x1xf32>
    %23 = arith.addf %19, %22 : vector<1x1xf32>
    %24 = math.rsqrt %23 : vector<1x1xf32>
    %25 = vector.broadcast %24 : vector<1x1xf32> to vector<1x64xf32>
    %26 = arith.mulf %21, %25 : vector<1x64xf32>
    %27 = arith.mulf %26, %0 : vector<1x64xf32>
    %28 = arith.addf %27, %1 : vector<1x64xf32>
    %c0_17 = arith.constant 0 : index
    %c0_18 = arith.constant 0 : index
    %c0_19 = arith.constant 0 : index
    %29 = vector.load %arg7[%c0_17, %c0_18, %c0_19] : memref<1x8x64xf32, #tpu.memory_space<vmem>>, vector<1x1x64xf32>
    %30 = vector.shape_cast %29 : vector<1x1x64xf32> to vector<1x64xf32>
    %31 = vector.shape_cast %28 : vector<1x64xf32> to vector<1x1x64xf32>
    tpu.vector_store %arg7[%c0_17, %c0_18, %c0_19], %31 {strides = array<i32>} : memref<1x8x64xf32, #tpu.memory_space<vmem>>, vector<1x1x64xf32>,
    %c1 = arith.constant 1 : index
    %c0_20 = arith.constant 0 : index
    %32 = vector.load %arg4[%c1, %c0_20] : memref<5x64xf32, #tpu.memory_space<vmem>>, vector<4x64xf32>
    %33 = arith.addf %5, %32 : vector<4x64xf32>
    %cst_21 = arith.constant dense<0.000000e+00> : vector<4xf32>
    %34 = vector.multi_reduction <add>, %33, %cst_21 [1] : vector<4x64xf32> to vector<4xf32>
    %35 = vector.shape_cast %34 : vector<4xf32> to vector<4x1xf32>
    %cst_22 = arith.constant 6.400000e+01 : f32
    %36 = vector.broadcast %cst_22 : f32 to vector<4x1xf32>
    %37 = arith.divf %35, %36 : vector<4x1xf32>
    %38 = vector.broadcast %37 : vector<4x1xf32> to vector<4x64xf32>
    %39 = arith.subf %33, %38 : vector<4x64xf32>
    %40 = arith.mulf %39, %39 : vector<4x64xf32>
    %cst_23 = arith.constant dense<0.000000e+00> : vector<4xf32>
    %41 = vector.multi_reduction <add>, %40, %cst_23 [1] : vector<4x64xf32> to vector<4xf32>
    %42 = vector.shape_cast %41 : vector<4xf32> to vector<4x1xf32>
    %cst_24 = arith.constant 6.400000e+01 : f32
    %43 = vector.broadcast %cst_24 : f32 to vector<4x1xf32>
    %44 = arith.divf %42, %43 : vector<4x1xf32>
    %45 = vector.broadcast %37 : vector<4x1xf32> to vector<4x64xf32>
    %46 = arith.subf %33, %45 : vector<4x64xf32>
    %cst_25 = arith.constant 9.99999974E-6 : f32
    %47 = vector.broadcast %cst_25 : f32 to vector<4x1xf32>
    %48 = arith.addf %44, %47 : vector<4x1xf32>
    %49 = math.rsqrt %48 : vector<4x1xf32>
    %50 = vector.broadcast %49 : vector<4x1xf32> to vector<4x64xf32>
    %51 = arith.mulf %46, %50 : vector<4x64xf32>
    %52 = vector.broadcast %0 : vector<1x64xf32> to vector<4x64xf32>
    %53 = arith.mulf %51, %52 : vector<4x64xf32>
    %54 = vector.broadcast %1 : vector<1x64xf32> to vector<4x64xf32>
    %55 = arith.addf %53, %54 : vector<4x64xf32>
    %c0_26 = arith.constant 0 : index
    %c1_27 = arith.constant 1 : index
    %c0_28 = arith.constant 0 : index
    %56 = vector.load %arg7[%c0_26, %c1_27, %c0_28] : memref<1x8x64xf32, #tpu.memory_space<vmem>>, vector<1x4x64xf32>
    %57 = vector.shape_cast %56 : vector<1x4x64xf32> to vector<4x64xf32>
    %58 = vector.shape_cast %55 : vector<4x64xf32> to vector<1x4x64xf32>
    tpu.vector_store %arg7[%c0_26, %c1_27, %c0_28], %58 {strides = array<i32>} : memref<1x8x64xf32, #tpu.memory_space<vmem>>, vector<1x4x64xf32>,
    %cst_29 = arith.constant 0.000000e+00 : f32
    %59 = vector.broadcast %cst_29 : f32 to vector<3x64xf32>
    %c0_30 = arith.constant 0 : index
    %c5 = arith.constant 5 : index
    %c0_31 = arith.constant 0 : index
    %60 = vector.load %arg7[%c0_30, %c5, %c0_31] : memref<1x8x64xf32, #tpu.memory_space<vmem>>, vector<1x3x64xf32>
    %61 = vector.shape_cast %60 : vector<1x3x64xf32> to vector<3x64xf32>
    %62 = vector.shape_cast %59 : vector<3x64xf32> to vector<1x3x64xf32>
    tpu.vector_store %arg7[%c0_30, %c5, %c0_31], %62 {strides = array<i32>} : memref<1x8x64xf32, #tpu.memory_space<vmem>>, vector<1x3x64xf32>,
    return
  }
  func.func @transform_0(%arg0: i32) -> (i32, i32, i32) {
    %c0_i32 = arith.constant 0 : i32
    %c0_i32_0 = arith.constant 0 : i32
    %c0_i32_1 = arith.constant 0 : i32
    return %arg0, %c0_i32, %c0_i32_0 : i32, i32, i32
  }
  func.func @transform_1(%arg0: i32) -> (i32, i32) {
    %c0_i32 = arith.constant 0 : i32
    %c0_i32_0 = arith.constant 0 : i32
    %c0_i32_1 = arith.constant 0 : i32
    return %c0_i32, %c0_i32_0 : i32, i32
  }
  func.func @transform_2(%arg0: i32) -> (i32, i32) {
    %c0_i32 = arith.constant 0 : i32
    %c0_i32_0 = arith.constant 0 : i32
    %c0_i32_1 = arith.constant 0 : i32
    return %c0_i32, %c0_i32_0 : i32, i32
  }
  func.func @transform_3(%arg0: i32) -> (i32, i32) {
    %c0_i32 = arith.constant 0 : i32
    %c0_i32_0 = arith.constant 0 : i32
    %c0_i32_1 = arith.constant 0 : i32
    return %c0_i32, %c0_i32_0 : i32, i32
  }
  func.func @transform_4(%arg0: i32) -> (i32, i32) {
    %c0_i32 = arith.constant 0 : i32
    %c0_i32_0 = arith.constant 0 : i32
    %c0_i32_1 = arith.constant 0 : i32
    return %c0_i32, %c0_i32_0 : i32, i32
  }
  func.func @transform_5(%arg0: i32) -> (i32, i32) {
    %c0_i32 = arith.constant 0 : i32
    %c0_i32_0 = arith.constant 0 : i32
    %c0_i32_1 = arith.constant 0 : i32
    return %c0_i32, %c0_i32_0 : i32, i32
  }
  func.func @transform_6(%arg0: i32) -> (i32, i32, i32) {
    %c0_i32 = arith.constant 0 : i32
    %c0_i32_0 = arith.constant 0 : i32
    %c0_i32_1 = arith.constant 0 : i32
    return %arg0, %c0_i32, %c0_i32_0 : i32, i32, i32
  }
}

module attributes {stable_mosaic.version = 11 : i64} {
  func.func @resblock_kernel(%arg0: i32, %arg1: i32, %arg2: memref<2x8x64xf32, #tpu.memory_space<vmem>>, %arg3: memref<1x1x64xf32, #tpu.memory_space<vmem>>, %arg4: memref<1x1x64xf32, #tpu.memory_space<vmem>>, %arg5: memref<1x64x192xbf16, #tpu.memory_space<vmem>>, %arg6: memref<1x1x192xf32, #tpu.memory_space<vmem>>, %arg7: memref<1x64x64xbf16, #tpu.memory_space<vmem>>, %arg8: memref<1x1x64xf32, #tpu.memory_space<vmem>>, %arg9: memref<1x1x64xf32, #tpu.memory_space<vmem>>, %arg10: memref<1x1x64xf32, #tpu.memory_space<vmem>>, %arg11: memref<1x64x256xbf16, #tpu.memory_space<vmem>>, %arg12: memref<1x1x256xf32, #tpu.memory_space<vmem>>, %arg13: memref<1x256x64xbf16, #tpu.memory_space<vmem>>, %arg14: memref<1x1x64xf32, #tpu.memory_space<vmem>>, %arg15: memref<2x8x64xf32, #tpu.memory_space<vmem>>) attributes {dimension_semantics = [#tpu.dimension_semantics<parallel>, #tpu.dimension_semantics<arbitrary>], iteration_bounds = array<i64: 1, 2>, scalar_prefetch = 0 : i64, scratch_operands = 0 : i64, tpu.core_type = #tpu.core_type<tc>, window_params = [{transform_indices = @transform_0, window_bounds = array<i64: 2, 8, 64>}, {transform_indices = @transform_1, window_bounds = array<i64: 1, 1, 64>}, {transform_indices = @transform_2, window_bounds = array<i64: 1, 1, 64>}, {transform_indices = @transform_3, window_bounds = array<i64: 1, 64, 192>}, {transform_indices = @transform_4, window_bounds = array<i64: 1, 1, 192>}, {transform_indices = @transform_5, window_bounds = array<i64: 1, 64, 64>}, {transform_indices = @transform_6, window_bounds = array<i64: 1, 1, 64>}, {transform_indices = @transform_7, window_bounds = array<i64: 1, 1, 64>}, {transform_indices = @transform_8, window_bounds = array<i64: 1, 1, 64>}, {transform_indices = @transform_9, window_bounds = array<i64: 1, 64, 256>}, {transform_indices = @transform_10, window_bounds = array<i64: 1, 1, 256>}, {transform_indices = @transform_11, window_bounds = array<i64: 1, 256, 64>}, {transform_indices = @transform_12, window_bounds = array<i64: 1, 1, 64>}, {transform_indices = @transform_13, window_bounds = array<i64: 2, 8, 64>}]} {
    %c0_i32 = arith.constant 0 : i32
    %0 = arith.cmpi eq, %arg1, %c0_i32 : i32
    %1 = arith.extui %0 : i1 to i32
    %c0_i32_0 = arith.constant 0 : i32
    %2 = arith.cmpi ne, %1, %c0_i32_0 : i32
    scf.if %2 {
      %c0_100 = arith.constant 0 : index
      %c0_101 = arith.constant 0 : index
      %c0_102 = arith.constant 0 : index
      %229 = vector.load %arg2[%c0_100, %c0_101, %c0_102] : memref<2x8x64xf32, #tpu.memory_space<vmem>>, vector<2x8x64xf32>
      %c0_103 = arith.constant 0 : index
      %c0_104 = arith.constant 0 : index
      %c0_105 = arith.constant 0 : index
      %230 = vector.load %arg15[%c0_103, %c0_104, %c0_105] : memref<2x8x64xf32, #tpu.memory_space<vmem>>, vector<2x8x64xf32>
      tpu.vector_store %arg15[%c0_103, %c0_104, %c0_105], %229 {strides = array<i32>} : memref<2x8x64xf32, #tpu.memory_space<vmem>>, vector<2x8x64xf32>,
    } else {
    }
    %c0 = arith.constant 0 : index
    %c0_1 = arith.constant 0 : index
    %c0_2 = arith.constant 0 : index
    %3 = vector.load %arg15[%c0, %c0_1, %c0_2] : memref<2x8x64xf32, #tpu.memory_space<vmem>>, vector<2x8x64xf32>
    %4 = vector.shape_cast %3 : vector<2x8x64xf32> to vector<16x64xf32>
    %c0_3 = arith.constant 0 : index
    %c0_4 = arith.constant 0 : index
    %c0_5 = arith.constant 0 : index
    %5 = vector.load %arg3[%c0_3, %c0_4, %c0_5] : memref<1x1x64xf32, #tpu.memory_space<vmem>>, vector<1x1x64xf32>
    %6 = vector.shape_cast %5 : vector<1x1x64xf32> to vector<1x64xf32>
    %c0_6 = arith.constant 0 : index
    %c0_7 = arith.constant 0 : index
    %c0_8 = arith.constant 0 : index
    %7 = vector.load %arg4[%c0_6, %c0_7, %c0_8] : memref<1x1x64xf32, #tpu.memory_space<vmem>>, vector<1x1x64xf32>
    %8 = vector.shape_cast %7 : vector<1x1x64xf32> to vector<1x64xf32>
    %cst = arith.constant dense<0.000000e+00> : vector<16xf32>
    %9 = vector.multi_reduction <add>, %4, %cst [1] : vector<16x64xf32> to vector<16xf32>
    %10 = vector.shape_cast %9 : vector<16xf32> to vector<16x1xf32>
    %cst_9 = arith.constant 6.400000e+01 : f32
    %11 = vector.broadcast %cst_9 : f32 to vector<16x1xf32>
    %12 = arith.divf %10, %11 : vector<16x1xf32>
    %13 = vector.broadcast %12 : vector<16x1xf32> to vector<16x64xf32>
    %14 = arith.subf %4, %13 : vector<16x64xf32>
    %15 = arith.mulf %14, %14 : vector<16x64xf32>
    %cst_10 = arith.constant dense<0.000000e+00> : vector<16xf32>
    %16 = vector.multi_reduction <add>, %15, %cst_10 [1] : vector<16x64xf32> to vector<16xf32>
    %17 = vector.shape_cast %16 : vector<16xf32> to vector<16x1xf32>
    %cst_11 = arith.constant 6.400000e+01 : f32
    %18 = vector.broadcast %cst_11 : f32 to vector<16x1xf32>
    %19 = arith.divf %17, %18 : vector<16x1xf32>
    %20 = vector.broadcast %12 : vector<16x1xf32> to vector<16x64xf32>
    %21 = arith.subf %4, %20 : vector<16x64xf32>
    %cst_12 = arith.constant 9.99999974E-6 : f32
    %22 = vector.broadcast %cst_12 : f32 to vector<16x1xf32>
    %23 = arith.addf %19, %22 : vector<16x1xf32>
    %24 = math.rsqrt %23 : vector<16x1xf32>
    %25 = vector.broadcast %24 : vector<16x1xf32> to vector<16x64xf32>
    %26 = arith.mulf %21, %25 : vector<16x64xf32>
    %27 = vector.broadcast %6 : vector<1x64xf32> to vector<16x64xf32>
    %28 = arith.mulf %26, %27 : vector<16x64xf32>
    %29 = vector.broadcast %8 : vector<1x64xf32> to vector<16x64xf32>
    %30 = arith.addf %28, %29 : vector<16x64xf32>
    %31 = arith.truncf %30 : vector<16x64xf32> to vector<16x64xbf16>
    %c0_13 = arith.constant 0 : index
    %c0_14 = arith.constant 0 : index
    %c0_15 = arith.constant 0 : index
    %32 = vector.load %arg5[%c0_13, %c0_14, %c0_15] : memref<1x64x192xbf16, #tpu.memory_space<vmem>>, vector<1x64x192xbf16>
    %33 = vector.shape_cast %32 : vector<1x64x192xbf16> to vector<64x192xbf16>
    %cst_16 = arith.constant dense<0.000000e+00> : vector<16x192xf32>
    %34 = tpu.matmul %31, %33, %cst_16 {dimension_numbers = #tpu.dot_dimension_numbers<[1], [0], [0], [1], [0, 0, 1, 1], [], []>} : vector<16x64xbf16>, vector<64x192xbf16>, vector<16x192xf32> -> vector<16x192xf32>
    %c0_17 = arith.constant 0 : index
    %c0_18 = arith.constant 0 : index
    %c0_19 = arith.constant 0 : index
    %35 = vector.load %arg6[%c0_17, %c0_18, %c0_19] : memref<1x1x192xf32, #tpu.memory_space<vmem>>, vector<1x1x192xf32>
    %36 = vector.shape_cast %35 : vector<1x1x192xf32> to vector<1x192xf32>
    %37 = vector.broadcast %36 : vector<1x192xf32> to vector<16x192xf32>
    %38 = arith.addf %34, %37 : vector<16x192xf32>
    %39 = arith.truncf %38 : vector<16x192xf32> to vector<16x192xbf16>
    %40 = tpu.iota {dimensions = array<i32: 1>} : vector<1x8xi32>
    %c5_i32 = arith.constant 5 : i32
    %41 = vector.broadcast %c5_i32 : i32 to vector<1x8xi32>
    %42 = arith.cmpi slt, %40, %41 : vector<1x8xi32>
    %cst_20 = arith.constant 0.000000e+00 : f32
    %cst_21 = arith.constant -1.000000e+30 : f32
    %43 = vector.broadcast %cst_20 : f32 to vector<1x8xf32>
    %44 = vector.broadcast %cst_21 : f32 to vector<1x8xf32>
    %45 = arith.select %42, %43, %44 : vector<1x8xi1>, vector<1x8xf32>
    %46 = vector.extract_strided_slice %39 {offsets = [0, 0], sizes = [8, 64], strides = [1, 1]} : vector<16x192xbf16> to vector<8x64xbf16>
    %47 = vector.extract_strided_slice %39 {offsets = [0, 64], sizes = [8, 64], strides = [1, 1]} : vector<16x192xbf16> to vector<8x64xbf16>
    %48 = vector.extract_strided_slice %39 {offsets = [0, 128], sizes = [8, 64], strides = [1, 1]} : vector<16x192xbf16> to vector<8x64xbf16>
    %cst_22 = arith.constant 0.000000e+00 : f32
    %49 = vector.broadcast %cst_22 : f32 to vector<8x64xf32>
    %50 = vector.extract_strided_slice %46 {offsets = [0, 0], sizes = [8, 32], strides = [1, 1]} : vector<8x64xbf16> to vector<8x32xbf16>
    %51 = vector.extract_strided_slice %47 {offsets = [0, 0], sizes = [8, 32], strides = [1, 1]} : vector<8x64xbf16> to vector<8x32xbf16>
    %cst_23 = arith.constant dense<0.000000e+00> : vector<8x8xf32>
    %52 = tpu.matmul %50, %51, %cst_23 {dimension_numbers = #tpu.dot_dimension_numbers<[1], [1], [0], [0], [0, 0, 1, 0], [], []>} : vector<8x32xbf16>, vector<8x32xbf16>, vector<8x8xf32> -> vector<8x8xf32>
    %53 = vector.broadcast %45 : vector<1x8xf32> to vector<8x8xf32>
    %54 = arith.addf %52, %53 : vector<8x8xf32>
    %cst_24 = arith.constant dense<0xFF800000> : vector<8xf32>
    %55 = vector.multi_reduction <maximumf>, %54, %cst_24 [1] : vector<8x8xf32> to vector<8xf32>
    %56 = vector.shape_cast %55 : vector<8xf32> to vector<8x1xf32>
    %57 = vector.broadcast %56 : vector<8x1xf32> to vector<8x8xf32>
    %58 = arith.subf %54, %57 : vector<8x8xf32>
    %59 = math.exp %58 : vector<8x8xf32>
    %cst_25 = arith.constant dense<0.000000e+00> : vector<8xf32>
    %60 = vector.multi_reduction <add>, %59, %cst_25 [1] : vector<8x8xf32> to vector<8xf32>
    %61 = vector.shape_cast %60 : vector<8xf32> to vector<8x1xf32>
    %62 = tpu.reciprocal %61 {approx = true} : vector<8x1xf32> -> vector<8x1xf32>
    %63 = vector.broadcast %62 : vector<8x1xf32> to vector<8x8xf32>
    %64 = arith.mulf %59, %63 : vector<8x8xf32>
    %65 = arith.truncf %64 : vector<8x8xf32> to vector<8x8xbf16>
    %66 = vector.extract_strided_slice %48 {offsets = [0, 0], sizes = [8, 32], strides = [1, 1]} : vector<8x64xbf16> to vector<8x32xbf16>
    %cst_26 = arith.constant dense<0.000000e+00> : vector<8x32xf32>
    %67 = tpu.matmul %65, %66, %cst_26 {dimension_numbers = #tpu.dot_dimension_numbers<[1], [0], [0], [1], [0, 0, 1, 1], [], []>} : vector<8x8xbf16>, vector<8x32xbf16>, vector<8x32xf32> -> vector<8x32xf32>
    %68 = arith.truncf %67 : vector<8x32xf32> to vector<8x32xbf16>
    %c0_27 = arith.constant 0 : index
    %c0_28 = arith.constant 0 : index
    %c0_29 = arith.constant 0 : index
    %69 = vector.load %arg7[%c0_27, %c0_28, %c0_29] : memref<1x64x64xbf16, #tpu.memory_space<vmem>>, vector<1x32x64xbf16>
    %70 = vector.shape_cast %69 : vector<1x32x64xbf16> to vector<32x64xbf16>
    %cst_30 = arith.constant dense<0.000000e+00> : vector<8x64xf32>
    %71 = tpu.matmul %68, %70, %cst_30 {dimension_numbers = #tpu.dot_dimension_numbers<[1], [0], [0], [1], [0, 0, 1, 1], [], []>} : vector<8x32xbf16>, vector<32x64xbf16>, vector<8x64xf32> -> vector<8x64xf32>
    %72 = arith.addf %49, %71 : vector<8x64xf32>
    %73 = vector.extract_strided_slice %46 {offsets = [0, 32], sizes = [8, 32], strides = [1, 1]} : vector<8x64xbf16> to vector<8x32xbf16>
    %74 = vector.extract_strided_slice %47 {offsets = [0, 32], sizes = [8, 32], strides = [1, 1]} : vector<8x64xbf16> to vector<8x32xbf16>
    %cst_31 = arith.constant dense<0.000000e+00> : vector<8x8xf32>
    %75 = tpu.matmul %73, %74, %cst_31 {dimension_numbers = #tpu.dot_dimension_numbers<[1], [1], [0], [0], [0, 0, 1, 0], [], []>} : vector<8x32xbf16>, vector<8x32xbf16>, vector<8x8xf32> -> vector<8x8xf32>
    %76 = vector.broadcast %45 : vector<1x8xf32> to vector<8x8xf32>
    %77 = arith.addf %75, %76 : vector<8x8xf32>
    %cst_32 = arith.constant dense<0xFF800000> : vector<8xf32>
    %78 = vector.multi_reduction <maximumf>, %77, %cst_32 [1] : vector<8x8xf32> to vector<8xf32>
    %79 = vector.shape_cast %78 : vector<8xf32> to vector<8x1xf32>
    %80 = vector.broadcast %79 : vector<8x1xf32> to vector<8x8xf32>
    %81 = arith.subf %77, %80 : vector<8x8xf32>
    %82 = math.exp %81 : vector<8x8xf32>
    %cst_33 = arith.constant dense<0.000000e+00> : vector<8xf32>
    %83 = vector.multi_reduction <add>, %82, %cst_33 [1] : vector<8x8xf32> to vector<8xf32>
    %84 = vector.shape_cast %83 : vector<8xf32> to vector<8x1xf32>
    %85 = tpu.reciprocal %84 {approx = true} : vector<8x1xf32> -> vector<8x1xf32>
    %86 = vector.broadcast %85 : vector<8x1xf32> to vector<8x8xf32>
    %87 = arith.mulf %82, %86 : vector<8x8xf32>
    %88 = arith.truncf %87 : vector<8x8xf32> to vector<8x8xbf16>
    %89 = vector.extract_strided_slice %48 {offsets = [0, 32], sizes = [8, 32], strides = [1, 1]} : vector<8x64xbf16> to vector<8x32xbf16>
    %cst_34 = arith.constant dense<0.000000e+00> : vector<8x32xf32>
    %90 = tpu.matmul %88, %89, %cst_34 {dimension_numbers = #tpu.dot_dimension_numbers<[1], [0], [0], [1], [0, 0, 1, 1], [], []>} : vector<8x8xbf16>, vector<8x32xbf16>, vector<8x32xf32> -> vector<8x32xf32>
    %91 = arith.truncf %90 : vector<8x32xf32> to vector<8x32xbf16>
    %c0_35 = arith.constant 0 : index
    %c32 = arith.constant 32 : index
    %c0_36 = arith.constant 0 : index
    %92 = vector.load %arg7[%c0_35, %c32, %c0_36] : memref<1x64x64xbf16, #tpu.memory_space<vmem>>, vector<1x32x64xbf16>
    %93 = vector.shape_cast %92 : vector<1x32x64xbf16> to vector<32x64xbf16>
    %cst_37 = arith.constant dense<0.000000e+00> : vector<8x64xf32>
    %94 = tpu.matmul %91, %93, %cst_37 {dimension_numbers = #tpu.dot_dimension_numbers<[1], [0], [0], [1], [0, 0, 1, 1], [], []>} : vector<8x32xbf16>, vector<32x64xbf16>, vector<8x64xf32> -> vector<8x64xf32>
    %95 = arith.addf %72, %94 : vector<8x64xf32>
    %96 = vector.extract_strided_slice %3 {offsets = [0, 0, 0], sizes = [1, 8, 64], strides = [1, 1, 1]} : vector<2x8x64xf32> to vector<1x8x64xf32>
    %97 = vector.shape_cast %96 : vector<1x8x64xf32> to vector<8x64xf32>
    %98 = arith.addf %97, %95 : vector<8x64xf32>
    %c0_38 = arith.constant 0 : index
    %c0_39 = arith.constant 0 : index
    %c0_40 = arith.constant 0 : index
    %99 = vector.load %arg8[%c0_38, %c0_39, %c0_40] : memref<1x1x64xf32, #tpu.memory_space<vmem>>, vector<1x1x64xf32>
    %100 = vector.shape_cast %99 : vector<1x1x64xf32> to vector<1x64xf32>
    %101 = vector.broadcast %100 : vector<1x64xf32> to vector<8x64xf32>
    %102 = arith.addf %98, %101 : vector<8x64xf32>
    %c0_41 = arith.constant 0 : index
    %c0_42 = arith.constant 0 : index
    %c0_43 = arith.constant 0 : index
    %103 = vector.load %arg15[%c0_41, %c0_42, %c0_43] : memref<2x8x64xf32, #tpu.memory_space<vmem>>, vector<1x8x64xf32>
    %104 = vector.shape_cast %103 : vector<1x8x64xf32> to vector<8x64xf32>
    %105 = vector.shape_cast %102 : vector<8x64xf32> to vector<1x8x64xf32>
    tpu.vector_store %arg15[%c0_41, %c0_42, %c0_43], %105 {strides = array<i32>} : memref<2x8x64xf32, #tpu.memory_space<vmem>>, vector<1x8x64xf32>,
    %106 = vector.extract_strided_slice %39 {offsets = [8, 0], sizes = [8, 64], strides = [1, 1]} : vector<16x192xbf16> to vector<8x64xbf16>
    %107 = vector.extract_strided_slice %39 {offsets = [8, 64], sizes = [8, 64], strides = [1, 1]} : vector<16x192xbf16> to vector<8x64xbf16>
    %108 = vector.extract_strided_slice %39 {offsets = [8, 128], sizes = [8, 64], strides = [1, 1]} : vector<16x192xbf16> to vector<8x64xbf16>
    %cst_44 = arith.constant 0.000000e+00 : f32
    %109 = vector.broadcast %cst_44 : f32 to vector<8x64xf32>
    %110 = vector.extract_strided_slice %106 {offsets = [0, 0], sizes = [8, 32], strides = [1, 1]} : vector<8x64xbf16> to vector<8x32xbf16>
    %111 = vector.extract_strided_slice %107 {offsets = [0, 0], sizes = [8, 32], strides = [1, 1]} : vector<8x64xbf16> to vector<8x32xbf16>
    %cst_45 = arith.constant dense<0.000000e+00> : vector<8x8xf32>
    %112 = tpu.matmul %110, %111, %cst_45 {dimension_numbers = #tpu.dot_dimension_numbers<[1], [1], [0], [0], [0, 0, 1, 0], [], []>} : vector<8x32xbf16>, vector<8x32xbf16>, vector<8x8xf32> -> vector<8x8xf32>
    %113 = vector.broadcast %45 : vector<1x8xf32> to vector<8x8xf32>
    %114 = arith.addf %112, %113 : vector<8x8xf32>
    %cst_46 = arith.constant dense<0xFF800000> : vector<8xf32>
    %115 = vector.multi_reduction <maximumf>, %114, %cst_46 [1] : vector<8x8xf32> to vector<8xf32>
    %116 = vector.shape_cast %115 : vector<8xf32> to vector<8x1xf32>
    %117 = vector.broadcast %116 : vector<8x1xf32> to vector<8x8xf32>
    %118 = arith.subf %114, %117 : vector<8x8xf32>
    %119 = math.exp %118 : vector<8x8xf32>
    %cst_47 = arith.constant dense<0.000000e+00> : vector<8xf32>
    %120 = vector.multi_reduction <add>, %119, %cst_47 [1] : vector<8x8xf32> to vector<8xf32>
    %121 = vector.shape_cast %120 : vector<8xf32> to vector<8x1xf32>
    %122 = tpu.reciprocal %121 {approx = true} : vector<8x1xf32> -> vector<8x1xf32>
    %123 = vector.broadcast %122 : vector<8x1xf32> to vector<8x8xf32>
    %124 = arith.mulf %119, %123 : vector<8x8xf32>
    %125 = arith.truncf %124 : vector<8x8xf32> to vector<8x8xbf16>
    %126 = vector.extract_strided_slice %108 {offsets = [0, 0], sizes = [8, 32], strides = [1, 1]} : vector<8x64xbf16> to vector<8x32xbf16>
    %cst_48 = arith.constant dense<0.000000e+00> : vector<8x32xf32>
    %127 = tpu.matmul %125, %126, %cst_48 {dimension_numbers = #tpu.dot_dimension_numbers<[1], [0], [0], [1], [0, 0, 1, 1], [], []>} : vector<8x8xbf16>, vector<8x32xbf16>, vector<8x32xf32> -> vector<8x32xf32>
    %128 = arith.truncf %127 : vector<8x32xf32> to vector<8x32xbf16>
    %c0_49 = arith.constant 0 : index
    %c0_50 = arith.constant 0 : index
    %c0_51 = arith.constant 0 : index
    %129 = vector.load %arg7[%c0_49, %c0_50, %c0_51] : memref<1x64x64xbf16, #tpu.memory_space<vmem>>, vector<1x32x64xbf16>
    %130 = vector.shape_cast %129 : vector<1x32x64xbf16> to vector<32x64xbf16>
    %cst_52 = arith.constant dense<0.000000e+00> : vector<8x64xf32>
    %131 = tpu.matmul %128, %130, %cst_52 {dimension_numbers = #tpu.dot_dimension_numbers<[1], [0], [0], [1], [0, 0, 1, 1], [], []>} : vector<8x32xbf16>, vector<32x64xbf16>, vector<8x64xf32> -> vector<8x64xf32>
    %132 = arith.addf %109, %131 : vector<8x64xf32>
    %133 = vector.extract_strided_slice %106 {offsets = [0, 32], sizes = [8, 32], strides = [1, 1]} : vector<8x64xbf16> to vector<8x32xbf16>
    %134 = vector.extract_strided_slice %107 {offsets = [0, 32], sizes = [8, 32], strides = [1, 1]} : vector<8x64xbf16> to vector<8x32xbf16>
    %cst_53 = arith.constant dense<0.000000e+00> : vector<8x8xf32>
    %135 = tpu.matmul %133, %134, %cst_53 {dimension_numbers = #tpu.dot_dimension_numbers<[1], [1], [0], [0], [0, 0, 1, 0], [], []>} : vector<8x32xbf16>, vector<8x32xbf16>, vector<8x8xf32> -> vector<8x8xf32>
    %136 = vector.broadcast %45 : vector<1x8xf32> to vector<8x8xf32>
    %137 = arith.addf %135, %136 : vector<8x8xf32>
    %cst_54 = arith.constant dense<0xFF800000> : vector<8xf32>
    %138 = vector.multi_reduction <maximumf>, %137, %cst_54 [1] : vector<8x8xf32> to vector<8xf32>
    %139 = vector.shape_cast %138 : vector<8xf32> to vector<8x1xf32>
    %140 = vector.broadcast %139 : vector<8x1xf32> to vector<8x8xf32>
    %141 = arith.subf %137, %140 : vector<8x8xf32>
    %142 = math.exp %141 : vector<8x8xf32>
    %cst_55 = arith.constant dense<0.000000e+00> : vector<8xf32>
    %143 = vector.multi_reduction <add>, %142, %cst_55 [1] : vector<8x8xf32> to vector<8xf32>
    %144 = vector.shape_cast %143 : vector<8xf32> to vector<8x1xf32>
    %145 = tpu.reciprocal %144 {approx = true} : vector<8x1xf32> -> vector<8x1xf32>
    %146 = vector.broadcast %145 : vector<8x1xf32> to vector<8x8xf32>
    %147 = arith.mulf %142, %146 : vector<8x8xf32>
    %148 = arith.truncf %147 : vector<8x8xf32> to vector<8x8xbf16>
    %149 = vector.extract_strided_slice %108 {offsets = [0, 32], sizes = [8, 32], strides = [1, 1]} : vector<8x64xbf16> to vector<8x32xbf16>
    %cst_56 = arith.constant dense<0.000000e+00> : vector<8x32xf32>
    %150 = tpu.matmul %148, %149, %cst_56 {dimension_numbers = #tpu.dot_dimension_numbers<[1], [0], [0], [1], [0, 0, 1, 1], [], []>} : vector<8x8xbf16>, vector<8x32xbf16>, vector<8x32xf32> -> vector<8x32xf32>
    %151 = arith.truncf %150 : vector<8x32xf32> to vector<8x32xbf16>
    %c0_57 = arith.constant 0 : index
    %c32_58 = arith.constant 32 : index
    %c0_59 = arith.constant 0 : index
    %152 = vector.load %arg7[%c0_57, %c32_58, %c0_59] : memref<1x64x64xbf16, #tpu.memory_space<vmem>>, vector<1x32x64xbf16>
    %153 = vector.shape_cast %152 : vector<1x32x64xbf16> to vector<32x64xbf16>
    %cst_60 = arith.constant dense<0.000000e+00> : vector<8x64xf32>
    %154 = tpu.matmul %151, %153, %cst_60 {dimension_numbers = #tpu.dot_dimension_numbers<[1], [0], [0], [1], [0, 0, 1, 1], [], []>} : vector<8x32xbf16>, vector<32x64xbf16>, vector<8x64xf32> -> vector<8x64xf32>
    %155 = arith.addf %132, %154 : vector<8x64xf32>
    %156 = vector.extract_strided_slice %3 {offsets = [1, 0, 0], sizes = [1, 8, 64], strides = [1, 1, 1]} : vector<2x8x64xf32> to vector<1x8x64xf32>
    %157 = vector.shape_cast %156 : vector<1x8x64xf32> to vector<8x64xf32>
    %158 = arith.addf %157, %155 : vector<8x64xf32>
    %c0_61 = arith.constant 0 : index
    %c0_62 = arith.constant 0 : index
    %c0_63 = arith.constant 0 : index
    %159 = vector.load %arg8[%c0_61, %c0_62, %c0_63] : memref<1x1x64xf32, #tpu.memory_space<vmem>>, vector<1x1x64xf32>
    %160 = vector.shape_cast %159 : vector<1x1x64xf32> to vector<1x64xf32>
    %161 = vector.broadcast %160 : vector<1x64xf32> to vector<8x64xf32>
    %162 = arith.addf %158, %161 : vector<8x64xf32>
    %c1 = arith.constant 1 : index
    %c0_64 = arith.constant 0 : index
    %c0_65 = arith.constant 0 : index
    %163 = vector.load %arg15[%c1, %c0_64, %c0_65] : memref<2x8x64xf32, #tpu.memory_space<vmem>>, vector<1x8x64xf32>
    %164 = vector.shape_cast %163 : vector<1x8x64xf32> to vector<8x64xf32>
    %165 = vector.shape_cast %162 : vector<8x64xf32> to vector<1x8x64xf32>
    tpu.vector_store %arg15[%c1, %c0_64, %c0_65], %165 {strides = array<i32>} : memref<2x8x64xf32, #tpu.memory_space<vmem>>, vector<1x8x64xf32>,
    %c0_66 = arith.constant 0 : index
    %c0_67 = arith.constant 0 : index
    %c0_68 = arith.constant 0 : index
    %166 = vector.load %arg15[%c0_66, %c0_67, %c0_68] : memref<2x8x64xf32, #tpu.memory_space<vmem>>, vector<2x8x64xf32>
    %167 = vector.shape_cast %166 : vector<2x8x64xf32> to vector<16x64xf32>
    %c0_69 = arith.constant 0 : index
    %c0_70 = arith.constant 0 : index
    %c0_71 = arith.constant 0 : index
    %168 = vector.load %arg9[%c0_69, %c0_70, %c0_71] : memref<1x1x64xf32, #tpu.memory_space<vmem>>, vector<1x1x64xf32>
    %169 = vector.shape_cast %168 : vector<1x1x64xf32> to vector<1x64xf32>
    %c0_72 = arith.constant 0 : index
    %c0_73 = arith.constant 0 : index
    %c0_74 = arith.constant 0 : index
    %170 = vector.load %arg10[%c0_72, %c0_73, %c0_74] : memref<1x1x64xf32, #tpu.memory_space<vmem>>, vector<1x1x64xf32>
    %171 = vector.shape_cast %170 : vector<1x1x64xf32> to vector<1x64xf32>
    %cst_75 = arith.constant dense<0.000000e+00> : vector<16xf32>
    %172 = vector.multi_reduction <add>, %167, %cst_75 [1] : vector<16x64xf32> to vector<16xf32>
    %173 = vector.shape_cast %172 : vector<16xf32> to vector<16x1xf32>
    %cst_76 = arith.constant 6.400000e+01 : f32
    %174 = vector.broadcast %cst_76 : f32 to vector<16x1xf32>
    %175 = arith.divf %173, %174 : vector<16x1xf32>
    %176 = vector.broadcast %175 : vector<16x1xf32> to vector<16x64xf32>
    %177 = arith.subf %167, %176 : vector<16x64xf32>
    %178 = arith.mulf %177, %177 : vector<16x64xf32>
    %cst_77 = arith.constant dense<0.000000e+00> : vector<16xf32>
    %179 = vector.multi_reduction <add>, %178, %cst_77 [1] : vector<16x64xf32> to vector<16xf32>
    %180 = vector.shape_cast %179 : vector<16xf32> to vector<16x1xf32>
    %cst_78 = arith.constant 6.400000e+01 : f32
    %181 = vector.broadcast %cst_78 : f32 to vector<16x1xf32>
    %182 = arith.divf %180, %181 : vector<16x1xf32>
    %183 = vector.broadcast %175 : vector<16x1xf32> to vector<16x64xf32>
    %184 = arith.subf %167, %183 : vector<16x64xf32>
    %cst_79 = arith.constant 9.99999974E-6 : f32
    %185 = vector.broadcast %cst_79 : f32 to vector<16x1xf32>
    %186 = arith.addf %182, %185 : vector<16x1xf32>
    %187 = math.rsqrt %186 : vector<16x1xf32>
    %188 = vector.broadcast %187 : vector<16x1xf32> to vector<16x64xf32>
    %189 = arith.mulf %184, %188 : vector<16x64xf32>
    %190 = vector.broadcast %169 : vector<1x64xf32> to vector<16x64xf32>
    %191 = arith.mulf %189, %190 : vector<16x64xf32>
    %192 = vector.broadcast %171 : vector<1x64xf32> to vector<16x64xf32>
    %193 = arith.addf %191, %192 : vector<16x64xf32>
    %194 = arith.truncf %193 : vector<16x64xf32> to vector<16x64xbf16>
    %c0_80 = arith.constant 0 : index
    %c0_81 = arith.constant 0 : index
    %c0_82 = arith.constant 0 : index
    %195 = vector.load %arg11[%c0_80, %c0_81, %c0_82] : memref<1x64x256xbf16, #tpu.memory_space<vmem>>, vector<1x64x256xbf16>
    %196 = vector.shape_cast %195 : vector<1x64x256xbf16> to vector<64x256xbf16>
    %cst_83 = arith.constant dense<0.000000e+00> : vector<16x256xf32>
    %197 = tpu.matmul %194, %196, %cst_83 {dimension_numbers = #tpu.dot_dimension_numbers<[1], [0], [0], [1], [0, 0, 1, 1], [], []>} : vector<16x64xbf16>, vector<64x256xbf16>, vector<16x256xf32> -> vector<16x256xf32>
    %c0_84 = arith.constant 0 : index
    %c0_85 = arith.constant 0 : index
    %c0_86 = arith.constant 0 : index
    %198 = vector.load %arg12[%c0_84, %c0_85, %c0_86] : memref<1x1x256xf32, #tpu.memory_space<vmem>>, vector<1x1x256xf32>
    %199 = vector.shape_cast %198 : vector<1x1x256xf32> to vector<1x256xf32>
    %200 = vector.broadcast %199 : vector<1x256xf32> to vector<16x256xf32>
    %201 = arith.addf %197, %200 : vector<16x256xf32>
    %cst_87 = arith.constant 1.702000e+00 : f32
    %202 = vector.broadcast %cst_87 : f32 to vector<16x256xf32>
    %203 = arith.mulf %202, %201 : vector<16x256xf32>
    %204 = arith.negf %203 : vector<16x256xf32>
    %205 = math.exp %204 : vector<16x256xf32>
    %cst_88 = arith.constant 1.000000e+00 : f32
    %206 = vector.broadcast %cst_88 : f32 to vector<16x256xf32>
    %207 = arith.addf %206, %205 : vector<16x256xf32>
    %208 = arith.divf %206, %207 : vector<16x256xf32>
    %209 = arith.mulf %201, %208 : vector<16x256xf32>
    %210 = arith.truncf %209 : vector<16x256xf32> to vector<16x256xbf16>
    %c0_89 = arith.constant 0 : index
    %c0_90 = arith.constant 0 : index
    %c0_91 = arith.constant 0 : index
    %211 = vector.load %arg13[%c0_89, %c0_90, %c0_91] : memref<1x256x64xbf16, #tpu.memory_space<vmem>>, vector<1x256x64xbf16>
    %212 = vector.shape_cast %211 : vector<1x256x64xbf16> to vector<256x64xbf16>
    %cst_92 = arith.constant dense<0.000000e+00> : vector<16x64xf32>
    %213 = tpu.matmul %210, %212, %cst_92 {dimension_numbers = #tpu.dot_dimension_numbers<[1], [0], [0], [1], [0, 0, 1, 1], [], []>} : vector<16x256xbf16>, vector<256x64xbf16>, vector<16x64xf32> -> vector<16x64xf32>
    %c0_93 = arith.constant 0 : index
    %c0_94 = arith.constant 0 : index
    %c0_95 = arith.constant 0 : index
    %214 = vector.load %arg14[%c0_93, %c0_94, %c0_95] : memref<1x1x64xf32, #tpu.memory_space<vmem>>, vector<1x1x64xf32>
    %215 = vector.shape_cast %214 : vector<1x1x64xf32> to vector<1x64xf32>
    %216 = vector.broadcast %215 : vector<1x64xf32> to vector<16x64xf32>
    %217 = arith.addf %213, %216 : vector<16x64xf32>
    %218 = arith.addf %167, %217 : vector<16x64xf32>
    %219 = vector.shape_cast %218 : vector<16x64xf32> to vector<2x8x64xf32>
    %220 = tpu.iota {dimensions = array<i32: 0>} : vector<8x1xi32>
    %c5_i32_96 = arith.constant 5 : i32
    %221 = vector.broadcast %c5_i32_96 : i32 to vector<8x1xi32>
    %222 = arith.cmpi slt, %220, %221 : vector<8x1xi32>
    %223 = arith.extui %222 : vector<8x1xi1> to vector<8x1xi32>
    %224 = arith.sitofp %223 : vector<8x1xi32> to vector<8x1xf32>
    %225 = vector.shape_cast %224 : vector<8x1xf32> to vector<1x8x1xf32>
    %226 = vector.broadcast %225 : vector<1x8x1xf32> to vector<2x8x64xf32>
    %227 = arith.mulf %219, %226 : vector<2x8x64xf32>
    %c0_97 = arith.constant 0 : index
    %c0_98 = arith.constant 0 : index
    %c0_99 = arith.constant 0 : index
    %228 = vector.load %arg15[%c0_97, %c0_98, %c0_99] : memref<2x8x64xf32, #tpu.memory_space<vmem>>, vector<2x8x64xf32>
    tpu.vector_store %arg15[%c0_97, %c0_98, %c0_99], %227 {strides = array<i32>} : memref<2x8x64xf32, #tpu.memory_space<vmem>>, vector<2x8x64xf32>,
    return
  }
  func.func @transform_0(%arg0: i32, %arg1: i32) -> (i32, i32, i32) {
    %c0_i32 = arith.constant 0 : i32
    %c0_i32_0 = arith.constant 0 : i32
    %c0_i32_1 = arith.constant 0 : i32
    return %arg0, %c0_i32, %c0_i32_0 : i32, i32, i32
  }
  func.func @transform_1(%arg0: i32, %arg1: i32) -> (i32, i32, i32) {
    %c0_i32 = arith.constant 0 : i32
    %c0_i32_0 = arith.constant 0 : i32
    %c0_i32_1 = arith.constant 0 : i32
    return %arg1, %c0_i32, %c0_i32_0 : i32, i32, i32
  }
  func.func @transform_2(%arg0: i32, %arg1: i32) -> (i32, i32, i32) {
    %c0_i32 = arith.constant 0 : i32
    %c0_i32_0 = arith.constant 0 : i32
    %c0_i32_1 = arith.constant 0 : i32
    return %arg1, %c0_i32, %c0_i32_0 : i32, i32, i32
  }
  func.func @transform_3(%arg0: i32, %arg1: i32) -> (i32, i32, i32) {
    %c0_i32 = arith.constant 0 : i32
    %c0_i32_0 = arith.constant 0 : i32
    %c0_i32_1 = arith.constant 0 : i32
    return %arg1, %c0_i32, %c0_i32_0 : i32, i32, i32
  }
  func.func @transform_4(%arg0: i32, %arg1: i32) -> (i32, i32, i32) {
    %c0_i32 = arith.constant 0 : i32
    %c0_i32_0 = arith.constant 0 : i32
    %c0_i32_1 = arith.constant 0 : i32
    return %arg1, %c0_i32, %c0_i32_0 : i32, i32, i32
  }
  func.func @transform_5(%arg0: i32, %arg1: i32) -> (i32, i32, i32) {
    %c0_i32 = arith.constant 0 : i32
    %c0_i32_0 = arith.constant 0 : i32
    %c0_i32_1 = arith.constant 0 : i32
    return %arg1, %c0_i32, %c0_i32_0 : i32, i32, i32
  }
  func.func @transform_6(%arg0: i32, %arg1: i32) -> (i32, i32, i32) {
    %c0_i32 = arith.constant 0 : i32
    %c0_i32_0 = arith.constant 0 : i32
    %c0_i32_1 = arith.constant 0 : i32
    return %arg1, %c0_i32, %c0_i32_0 : i32, i32, i32
  }
  func.func @transform_7(%arg0: i32, %arg1: i32) -> (i32, i32, i32) {
    %c0_i32 = arith.constant 0 : i32
    %c0_i32_0 = arith.constant 0 : i32
    %c0_i32_1 = arith.constant 0 : i32
    return %arg1, %c0_i32, %c0_i32_0 : i32, i32, i32
  }
  func.func @transform_8(%arg0: i32, %arg1: i32) -> (i32, i32, i32) {
    %c0_i32 = arith.constant 0 : i32
    %c0_i32_0 = arith.constant 0 : i32
    %c0_i32_1 = arith.constant 0 : i32
    return %arg1, %c0_i32, %c0_i32_0 : i32, i32, i32
  }
  func.func @transform_9(%arg0: i32, %arg1: i32) -> (i32, i32, i32) {
    %c0_i32 = arith.constant 0 : i32
    %c0_i32_0 = arith.constant 0 : i32
    %c0_i32_1 = arith.constant 0 : i32
    return %arg1, %c0_i32, %c0_i32_0 : i32, i32, i32
  }
  func.func @transform_10(%arg0: i32, %arg1: i32) -> (i32, i32, i32) {
    %c0_i32 = arith.constant 0 : i32
    %c0_i32_0 = arith.constant 0 : i32
    %c0_i32_1 = arith.constant 0 : i32
    return %arg1, %c0_i32, %c0_i32_0 : i32, i32, i32
  }
  func.func @transform_11(%arg0: i32, %arg1: i32) -> (i32, i32, i32) {
    %c0_i32 = arith.constant 0 : i32
    %c0_i32_0 = arith.constant 0 : i32
    %c0_i32_1 = arith.constant 0 : i32
    return %arg1, %c0_i32, %c0_i32_0 : i32, i32, i32
  }
  func.func @transform_12(%arg0: i32, %arg1: i32) -> (i32, i32, i32) {
    %c0_i32 = arith.constant 0 : i32
    %c0_i32_0 = arith.constant 0 : i32
    %c0_i32_1 = arith.constant 0 : i32
    return %arg1, %c0_i32, %c0_i32_0 : i32, i32, i32
  }
  func.func @transform_13(%arg0: i32, %arg1: i32) -> (i32, i32, i32) {
    %c0_i32 = arith.constant 0 : i32
    %c0_i32_0 = arith.constant 0 : i32
    %c0_i32_1 = arith.constant 0 : i32
    return %arg0, %c0_i32, %c0_i32_0 : i32, i32, i32
  }
}

module attributes {stable_mosaic.version = 11 : i64} {
  func.func @head_kernel(%arg0: i32, %arg1: memref<2x64xf32, #tpu.memory_space<vmem>>, %arg2: memref<1x64xf32, #tpu.memory_space<vmem>>, %arg3: memref<1x64xf32, #tpu.memory_space<vmem>>, %arg4: memref<64x32xbf16, #tpu.memory_space<vmem>>, %arg5: memref<2x32xf32, #tpu.memory_space<vmem>>) attributes {dimension_semantics = [#tpu.dimension_semantics<arbitrary>], iteration_bounds = array<i64: 1>, scalar_prefetch = 0 : i64, scratch_operands = 0 : i64, tpu.core_type = #tpu.core_type<tc>, window_params = [{pipeline_mode = #tpu.pipeline_mode<synchronous>, transform_indices = @transform_0, window_bounds = array<i64: 2, 64>}, {pipeline_mode = #tpu.pipeline_mode<synchronous>, transform_indices = @transform_1, window_bounds = array<i64: 1, 64>}, {pipeline_mode = #tpu.pipeline_mode<synchronous>, transform_indices = @transform_2, window_bounds = array<i64: 1, 64>}, {pipeline_mode = #tpu.pipeline_mode<synchronous>, transform_indices = @transform_3, window_bounds = array<i64: 64, 32>}, {pipeline_mode = #tpu.pipeline_mode<synchronous>, transform_indices = @transform_4, window_bounds = array<i64: 2, 32>}]} {
    %c0 = arith.constant 0 : index
    %c0_0 = arith.constant 0 : index
    %0 = vector.load %arg1[%c0, %c0_0] : memref<2x64xf32, #tpu.memory_space<vmem>>, vector<2x64xf32>
    %c0_1 = arith.constant 0 : index
    %c0_2 = arith.constant 0 : index
    %1 = vector.load %arg2[%c0_1, %c0_2] : memref<1x64xf32, #tpu.memory_space<vmem>>, vector<1x64xf32>
    %c0_3 = arith.constant 0 : index
    %c0_4 = arith.constant 0 : index
    %2 = vector.load %arg3[%c0_3, %c0_4] : memref<1x64xf32, #tpu.memory_space<vmem>>, vector<1x64xf32>
    %cst = arith.constant dense<0.000000e+00> : vector<2xf32>
    %3 = vector.multi_reduction <add>, %0, %cst [1] : vector<2x64xf32> to vector<2xf32>
    %4 = vector.shape_cast %3 : vector<2xf32> to vector<2x1xf32>
    %cst_5 = arith.constant 6.400000e+01 : f32
    %5 = vector.broadcast %cst_5 : f32 to vector<2x1xf32>
    %6 = arith.divf %4, %5 : vector<2x1xf32>
    %7 = vector.broadcast %6 : vector<2x1xf32> to vector<2x64xf32>
    %8 = arith.subf %0, %7 : vector<2x64xf32>
    %9 = arith.mulf %8, %8 : vector<2x64xf32>
    %cst_6 = arith.constant dense<0.000000e+00> : vector<2xf32>
    %10 = vector.multi_reduction <add>, %9, %cst_6 [1] : vector<2x64xf32> to vector<2xf32>
    %11 = vector.shape_cast %10 : vector<2xf32> to vector<2x1xf32>
    %cst_7 = arith.constant 6.400000e+01 : f32
    %12 = vector.broadcast %cst_7 : f32 to vector<2x1xf32>
    %13 = arith.divf %11, %12 : vector<2x1xf32>
    %14 = vector.broadcast %6 : vector<2x1xf32> to vector<2x64xf32>
    %15 = arith.subf %0, %14 : vector<2x64xf32>
    %cst_8 = arith.constant 9.99999974E-6 : f32
    %16 = vector.broadcast %cst_8 : f32 to vector<2x1xf32>
    %17 = arith.addf %13, %16 : vector<2x1xf32>
    %18 = math.rsqrt %17 : vector<2x1xf32>
    %19 = vector.broadcast %18 : vector<2x1xf32> to vector<2x64xf32>
    %20 = arith.mulf %15, %19 : vector<2x64xf32>
    %21 = vector.broadcast %1 : vector<1x64xf32> to vector<2x64xf32>
    %22 = arith.mulf %20, %21 : vector<2x64xf32>
    %23 = vector.broadcast %2 : vector<1x64xf32> to vector<2x64xf32>
    %24 = arith.addf %22, %23 : vector<2x64xf32>
    %25 = arith.truncf %24 : vector<2x64xf32> to vector<2x64xbf16>
    %c0_9 = arith.constant 0 : index
    %c0_10 = arith.constant 0 : index
    %26 = vector.load %arg4[%c0_9, %c0_10] : memref<64x32xbf16, #tpu.memory_space<vmem>>, vector<64x32xbf16>
    %cst_11 = arith.constant dense<0.000000e+00> : vector<2x32xf32>
    %27 = tpu.matmul %25, %26, %cst_11 {dimension_numbers = #tpu.dot_dimension_numbers<[1], [0], [0], [1], [0, 0, 1, 1], [], []>} : vector<2x64xbf16>, vector<64x32xbf16>, vector<2x32xf32> -> vector<2x32xf32>
    %28 = arith.mulf %27, %27 : vector<2x32xf32>
    %cst_12 = arith.constant dense<0.000000e+00> : vector<2xf32>
    %29 = vector.multi_reduction <add>, %28, %cst_12 [1] : vector<2x32xf32> to vector<2xf32>
    %30 = vector.shape_cast %29 : vector<2xf32> to vector<2x1xf32>
    %cst_13 = arith.constant 1.000000e-24 : f32
    %31 = vector.broadcast %cst_13 : f32 to vector<2x1xf32>
    %32 = arith.maximumf %30, %31 : vector<2x1xf32>
    %33 = math.rsqrt %32 : vector<2x1xf32>
    %34 = vector.broadcast %33 : vector<2x1xf32> to vector<2x32xf32>
    %35 = arith.mulf %27, %34 : vector<2x32xf32>
    %c0_14 = arith.constant 0 : index
    %c0_15 = arith.constant 0 : index
    %36 = vector.load %arg5[%c0_14, %c0_15] : memref<2x32xf32, #tpu.memory_space<vmem>>, vector<2x32xf32>
    tpu.vector_store %arg5[%c0_14, %c0_15], %35 {strides = array<i32>} : memref<2x32xf32, #tpu.memory_space<vmem>>, vector<2x32xf32>,
    return
  }
  func.func @transform_0(%arg0: i32) -> (i32, i32) {
    %c0_i32 = arith.constant 0 : i32
    %c0_i32_0 = arith.constant 0 : i32
    %c0_i32_1 = arith.constant 0 : i32
    return %c0_i32, %c0_i32_0 : i32, i32
  }
  func.func @transform_1(%arg0: i32) -> (i32, i32) {
    %c0_i32 = arith.constant 0 : i32
    %c0_i32_0 = arith.constant 0 : i32
    %c0_i32_1 = arith.constant 0 : i32
    return %c0_i32, %c0_i32_0 : i32, i32
  }
  func.func @transform_2(%arg0: i32) -> (i32, i32) {
    %c0_i32 = arith.constant 0 : i32
    %c0_i32_0 = arith.constant 0 : i32
    %c0_i32_1 = arith.constant 0 : i32
    return %c0_i32, %c0_i32_0 : i32, i32
  }
  func.func @transform_3(%arg0: i32) -> (i32, i32) {
    %c0_i32 = arith.constant 0 : i32
    %c0_i32_0 = arith.constant 0 : i32
    %c0_i32_1 = arith.constant 0 : i32
    return %c0_i32, %c0_i32_0 : i32, i32
  }
  func.func @transform_4(%arg0: i32) -> (i32, i32) {
    %c0_i32 = arith.constant 0 : i32
    %c0_i32_0 = arith.constant 0 : i32
    %c0_i32_1 = arith.constant 0 : i32
    return %c0_i32, %c0_i32_0 : i32, i32
  }
}

</mosaic_0001>

<bundles_post_ra>
// kernel: _lambda_.5
= control target key start
LH: loop header
LB: loop body
LE: loop exit
PB: predicated region body
PF: predicated region fallthrough
CT: control target
= control target key end

     0   :  { %vm22_vm0 = vcmask 517120   ;;  %s256_s0 = inlined_call_operand.vmem [shape: f32[2,64], index: 0, kind: input, shape index: {}]   ;;  %s257_s1 = inlined_call_operand.vmem [shape: f32[1,64], index: 1, kind: input, shape index: {}]   ;;  %s258_s2 = inlined_call_operand.vmem [shape: f32[1,64], index: 2, kind: input, shape index: {}]   ;;  %s259_s3 = inlined_call_operand.vmem [shape: bf16[64,32], index: 3, kind: input, shape index: {}]   ;;  %s260_s4 = inlined_call_operand.hbm [shape: f32[2,32], index: 4, kind: output, shape index: {}]  }
   0x1   :  { %v19_v0 = vld [vmem:[%s256_s0] sm:$0x3] }
   0x2   :  { %v23_v1 = vsel %vm22_vm0, %v19_v0, 0.0 }
   0x3   :  { %9 = vsyncpa [#allocation3], 0  ;;  %24 = vadd.xlane.f32.xlu0 %v23_v1  ;;  %v201_v2 = vmov 64.0   ;;  %v164_v14 = vld [vmem:[%s259_s3 + $0x18] sm:$0xff]  ;;  %v163_v15 = vld [vmem:[%s259_s3 + $0x10] sm:$0xff]  ;;  %vm93_vm5 = vcmask 523264  }
   0x4   :  { %169 = vrcp.f32 %v201_v2  ;;  %101 = vmatpush.bf16.msra.mxu0 %v164_v14  ;;  %v162_v16 = vld [vmem:[%s259_s3 + $0x8] sm:$0xff]  ;;  %v161_v17 = vld [vmem:[%s259_s3] sm:$0xff]  ;;  %vm111_vm6 = vcmask 254976   ;;  %s135_s29 = sshll.u32 %s260_s4, 4  ;;  %s136_s29 = int_to_ptr.hbm [resolvable:$true] %s135_s29 }
   0x5   :  { %v167_v27 = vld [vmem:[%s257_s1] ss:$0 sm:$0xff]  ;;  %s202_s1 = smov [#allocation2]  }
   0x6   :  { %v168_v30 = vld [vmem:[%s258_s2] ss:$0 sm:$0xff]  ;;  %s133_s2 = sshll.u32 %s202_s1, 4  ;;  %s134_s2 = int_to_ptr.vmem [resolvable:$true] %s133_s2 }
   0x8   :  { %102 = vmatpush.bf16.msra.mxu0 %v163_v15 }
   0xa   :  { %v170_v3 = vpop.eup %169 }
   0xb   :  { %v27_v4 = vmul.f32 64.0, %v170_v3  ;;  %vm31_vm1 = vweird.f32 %v170_v3 }
   0xc   :  { %103 = vmatpush.bf16.msra.mxu0 %v162_v16 }
   0xd   :  { %v28_v5 = vsub.f32 1.0, %v27_v4 }
   0xf   :  { %v29_v6 = vmul.f32 %v170_v3, %v28_v5 }
  0x10   :  { %104 = vmatpush.bf16.msra.mxu0 %v161_v17 }
  0x11   :  { %v30_v7 = vadd.f32 %v170_v3, %v29_v6 }
  0x13   :  { %v32_v8 = vsel %vm31_vm1, %v170_v3, %v30_v7 }
  0x76   :  { %v25_v9 = vpop.xlane.xlu0 %24 }
  0x77   :  { %v33_v10 = vmul.f32 %v32_v8, %v25_v9 }
  0x79   :  { %v34_v11 = vsub.f32 %v19_v0, %v33_v10 }
  0x7b   :  { %v35_v12 = vmul.f32 %v34_v11, %v34_v11 }
  0x7d   :  { %v36_v13 = vsel %vm22_vm0, %v35_v12, 0.0 }
  0x7e   :  { %37 = vadd.xlane.f32.xlu0 %v36_v13 }
  0xf1   :  { %v38_v18 = vpop.xlane.xlu0 %37 }
  0xf2   :  { %v39_v19 = vmul.f32 %v38_v18, %v32_v8 }
  0xf4   :  { %v40_v20 = vadd.f32 1e-05, %v39_v19 }
  0xf6   :  { %171 = vrsqrt.f32 %v40_v20  ;;  %vm47_vm3 = vweird.f32 %v40_v20 }
  0xfc   :  { %v172_v21 = vpop.eup %171 }
  0xfd   :  { %v42_v22 = vmul.f32 %v172_v21, %v40_v20  ;;  %vm48_vm2 = vweird.f32 %v172_v21 }
  0xfe   :  { %vm49_vm4 = vmor %vm47_vm3, %vm48_vm2 }
  0xff   :  { %v43_v23 = vmul.f32 %v172_v21, %v42_v22 }
 0x101   :  { %v44_v24 = vmul.f32 0.5, %v43_v23 }
 0x103   :  { %v45_v25 = vsub.f32 1.5, %v44_v24 }
 0x105   :  { %v46_v26 = vmul.f32 %v172_v21, %v45_v25 }
 0x107   :  { %v50_v28 = vsel %vm49_vm4, %v172_v21, %v46_v26 }
 0x108   :  { %v51_v29 = vmul.f32 %v50_v28, %v34_v11 }
 0x10a   :  { %v55_v31 = vmul.f32 %v167_v27, %v51_v29 }
 0x10c   :  { %v59_v32 = vadd.f32 %v168_v30, %v55_v31 }
 0x10e   :  { %v60_v33 = vpack.c.bf16 %v59_v32, %v59_v32 }
 0x110   :  { %160 = vmatmul.msk.bf16.vlgmr.msra.gmra.mxu0 %vm93_vm5, %v60_v33 }
 0x18d   :  { %v106_v34 = vpop.f32.mrf.mxu0 }
 0x18e   :  { %v110_v35 = vmul.f32 %v106_v34, %v106_v34 }
 0x190   :  { %v112_v36 = vsel %vm111_vm6, %v110_v35, 0.0 }
 0x191   :  { %113 = vadd.xlane.f32.xlu1 %v112_v36 }
 0x195   :  { %v108_v37 = vpop.f32.mrf.mxu0 }
 0x204   :  { %v114_v38 = vpop.xlane.xlu1 %113 }
 0x205   :  { %v115_v39 = vmax.f32 %v114_v38, 1e-24 }
 0x207   :  { %173 = vrsqrt.f32 %v115_v39  ;;  %vm122_vm8 = vweird.f32 %v115_v39 }
 0x20d   :  { %v174_v40 = vpop.eup %173 }
 0x20e   :  { %v117_v41 = vmul.f32 %v174_v40, %v115_v39  ;;  %vm123_vm7 = vweird.f32 %v174_v40 }
 0x20f   :  { %vm124_vm9 = vmor %vm122_vm8, %vm123_vm7 }
 0x210   :  { %v118_v42 = vmul.f32 %v174_v40, %v117_v41 }
 0x212   :  { %v119_v43 = vmul.f32 0.5, %v118_v42 }
 0x214   :  { %v120_v44 = vsub.f32 1.5, %v119_v43 }
 0x216   :  { %v121_v45 = vmul.f32 %v174_v40, %v120_v44 }
 0x218   :  { %v125_v46 = vsel %vm124_vm9, %v174_v40, %v121_v45 }
 0x219   :  { %v126_v47 = vmul.f32 %v125_v46, %v106_v34 }
 0x21b   :  { %127 = vst.msk [vmem:[#allocation2] sm:$0x3] %vm111_vm6, %v126_v47 }
 0x21c   :  { %138 = dma.vmem_to_hbm [thread:$0]  %s134_s2, 32, %s136_s29, [#allocation3]  }
 0x21d   :  { %199 = dma.done.wait [#allocation3], 32  }
 0x21e   :  { %200 = vsyncadd [#allocation3], 4294967264 }
 0x21f   :  { %143 = vsyncpa [#allocation3], 1 }

// kernel: _lambda_.3
= control target key start
LH: loop header
LB: loop body
LE: loop exit
PB: predicated region body
PF: predicated region fallthrough
CT: control target
= control target key end

     0   :  { %s1168_s21 = smov 0   ;;  %s1367_s0 = inlined_call_operand.vmem [shape: bf16[2,4,768], index: 0, kind: input, shape index: {}]   ;;  %s1368_s1 = inlined_call_operand.vmem [shape: bf16[768,64], index: 1, kind: input, shape index: {}]   ;;  %s1369_s2 = inlined_call_operand.vmem [shape: f32[1,64], index: 2, kind: input, shape index: {}]   ;;  %s1370_s3 = inlined_call_operand.vmem [shape: f32[5,64], index: 3, kind: input, shape index: {}]   ;;  %s1371_s4 = inlined_call_operand.vmem [shape: f32[1,64], index: 4, kind: input, shape index: {}]   ;;  %s1372_s5 = inlined_call_operand.vmem [shape: f32[1,64], index: 5, kind: input, shape index: {}]   ;;  %s1373_s6 = inlined_call_operand.vmem [shape: f32[2,8,64], index: 6, kind: output, shape index: {}]  }
   0x1 LB: > { %s857_s22 = sadd.s32 4294967295, %s1129_s21   ;;  %p861_p0 = scmp.ge.s32.totalorder %s1129_s21, 1  ;;  %s1129_s21 = sphi %s1168_s21, %s16_s21  }
   0x2   : > { %p212_p1 = scmp.lt.s32.totalorder %s1129_s21, 3 }
   0x4   : > { %p213_p2 = pnand %p861_p0, %p212_p1 }
   0x5   : > { %p241_p3 = scmp.lt.s32.totalorder (!%p213_p2), %s857_s22, 1 }
   0x6   : > { %216 = sbr.rel (%p213_p2) target bundleno = 474 (0x1da), region = 44 }
   0xb   : > { %v1065_v0 = vld [vmem:[%s1368_s1 + $0x38] sm:$0xff]  ;;  %v1064_v2 = vld [vmem:[%s1368_s1 + $0x30] sm:$0xff]  ;;  %s1375_s22 = smov (!%p241_p3, %s857_s22), 1  ;;  %v1063_v8 = vld [vmem:[%s1368_s1 + $0x28] sm:$0xff]  ;;  %vm353_vm0 = vcmask 516096   ;;  %v1131_v60 = vmov 64.0  }
   0xc   : > { %v1073_v1 = vld [vmem:[%s1368_s1 + $0x78] sm:$0xff]  ;;  %692 = vmatpush.bf16.msra.mxu0 %v1065_v0  ;;  %v1072_v3 = vld [vmem:[%s1368_s1 + $0x70] sm:$0xff]  ;;  %s1106_s13 = smul.u32 12, %s1375_s22  ;;  %v1071_v9 = vld [vmem:[%s1368_s1 + $0x68] sm:$0xff]  ;;  %1117 = vrcp.f32 %v1131_v60  ;;  %s863_s16 = sshll.u32 %s1375_s22, 3  ;;  %vm802_vm2 = vcmask 518144  }
   0xd   : > { %705 = vmatpush.bf16.msra.mxu1 %v1073_v1  ;;  %v1081_v4 = vld [vmem:[%s1368_s1 + $0xb8] sm:$0xff]  ;;  %v1080_v6 = vld [vmem:[%s1368_s1 + $0xb0] sm:$0xff]  ;;  %v1079_v10 = vld [vmem:[%s1368_s1 + $0xa8] sm:$0xff]  ;;  %s1346_s19 = scalar_lea.vmem %s1373_s6, %s863_s16  ;;  %vm770_vm3 = vcmask 519168  }
   0xe   : > { %v1089_v5 = vld [vmem:[%s1368_s1 + $0xf8] sm:$0xff]  ;;  %718 = vmatpush.bf16.msra.mxu2 %v1081_v4  ;;  %v1088_v7 = vld [vmem:[%s1368_s1 + $0xf0] sm:$0xff]  ;;  %s1215_s26 = scalar_lea.vmem %s1367_s0, %s1106_s13  ;;  %v1087_v11 = vld [vmem:[%s1368_s1 + $0xe8] sm:$0xff] }
   0xf   : > { %731 = vmatpush.bf16.msra.mxu3 %v1089_v5  ;;  %v1062_v12 = vld [vmem:[%s1368_s1 + $0x20] sm:$0xff]  ;;  %v1061_v18 = vld [vmem:[%s1368_s1 + $0x18] sm:$0xff]  ;;  %v1060_v25 = vld [vmem:[%s1368_s1 + $0x10] sm:$0xff] }
  0x10   : > { %693 = vmatpush.bf16.msra.mxu0 %v1064_v2  ;;  %v1070_v13 = vld [vmem:[%s1368_s1 + $0x60] sm:$0xff]  ;;  %v1069_v19 = vld [vmem:[%s1368_s1 + $0x58] sm:$0xff]  ;;  %v1068_v26 = vld [vmem:[%s1368_s1 + $0x50] sm:$0xff] }
  0x11   : > { %706 = vmatpush.bf16.msra.mxu1 %v1072_v3  ;;  %v252_v14 = vld [vmem:[%s1215_s26] sm:$0xff]  ;;  %v1077_v22 = vld [vmem:[%s1368_s1 + $0x98] sm:$0xff]  ;;  %v1076_v27 = vld [vmem:[%s1368_s1 + $0x90] sm:$0xff] }
  0x12   : > { %719 = vmatpush.bf16.msra.mxu2 %v1080_v6  ;;  %v1078_v15 = vld [vmem:[%s1368_s1 + $0xa0] sm:$0xff]  ;;  %388 = vst [vmem:[#allocation1] ss:$4 sm:$0xff] %v252_v14  ;;  %v1085_v23 = vld [vmem:[%s1368_s1 + $0xd8] sm:$0xff]  ;;  %v1084_v28 = vld [vmem:[%s1368_s1 + $0xd0] sm:$0xff]  ;;  %v1118_v61 = vpop.eup %1117 }
  0x13   : > { %732 = vmatpush.bf16.msra.mxu3 %v1088_v7  ;;  %v1086_v16 = vld [vmem:[%s1368_s1 + $0xe0] sm:$0xff]  ;;  %v253_v29 = vld [vmem:[%s1215_s26 + $0x8] sm:$0xf]  ;;  %v1097_v36 = vld [vmem:[%s1368_s1 + $0x138] sm:$0xff]  ;;  %v358_v62 = vmul.f32 64.0, %v1118_v61  ;;  %vm362_vm1 = vweird.f32 %v1118_v61 }
  0x14   : > { %694 = vmatpush.bf16.msra.mxu0 %v1063_v8  ;;  %v350_v17 = vld [vmem:[%s1369_s2] sm:$0x1]  ;;  %v1059_v30 = vld [vmem:[%s1368_s1 + $0x8] sm:$0xff]  ;;  %391 = vst [vmem:[#allocation1 + $0x20] ss:$4 sm:$0xff] %v253_v29  ;;  %v1105_v37 = vld [vmem:[%s1368_s1 + $0x178] sm:$0xff] }
  0x15   : > { %707 = vmatpush.bf16.msra.mxu1 %v1071_v9  ;;  %v351_v20 = vld [vmem:[%s1370_s3] sm:$0x1]  ;;  %v1067_v31 = vld [vmem:[%s1368_s1 + $0x48] sm:$0xff]  ;;  %v1096_v42 = vld [vmem:[%s1368_s1 + $0x130] sm:$0xff]  ;;  %v359_v63 = vsub.f32 1.0, %v358_v62 }
  0x16   : > { %720 = vmatpush.bf16.msra.mxu2 %v1079_v10  ;;  %v1245_v21 = vadd.f32 %v351_v20, %v350_v17  ;;  %v1075_v32 = vld [vmem:[%s1368_s1 + $0x88] sm:$0xff]  ;;  %v1058_v34 = vld [vmem:[%s1368_s1] sm:$0xff]  ;;  %v1104_v43 = vld [vmem:[%s1368_s1 + $0x170] sm:$0xff]  ;;  %v1132_v10 = vmov 0.0  }
  0x17   : > { %733 = vmatpush.bf16.msra.mxu3 %v1087_v11  ;;  %v1083_v33 = vld [vmem:[%s1368_s1 + $0xc8] sm:$0xff]  ;;  %v1066_v35 = vld [vmem:[%s1368_s1 + $0x40] sm:$0xff]  ;;  %v1093_v50 = vld [vmem:[%s1368_s1 + $0x118] sm:$0xff]  ;;  %v360_v0 = vmul.f32 %v1118_v61, %v359_v63  ;;  %803 = vst.msk [vmem:[%s1346_s19 + $0x5] sm:$0x7] %vm802_vm2, %v1132_v10 }
  0x18   : > { %695 = vmatpush.bf16.msra.mxu0 %v1062_v12  ;;  %v354_v24 = vsel %vm353_vm0, %v1245_v21, 0.0  ;;  %v1074_v38 = vld [vmem:[%s1368_s1 + $0x80] sm:$0xff]  ;;  %v1095_v46 = vld [vmem:[%s1368_s1 + $0x128] sm:$0xff]  ;;  %v1101_v51 = vld [vmem:[%s1368_s1 + $0x158] sm:$0xff] }
  0x19   : > { %708 = vmatpush.bf16.msra.mxu1 %v1070_v13  ;;  %355 = vadd.xlane.f32.xlu0 %v354_v24  ;;  %v1082_v39 = vld [vmem:[%s1368_s1 + $0xc0] sm:$0xff]  ;;  %v393_v41 = vld.sshfl [vmem:[#allocation1 + $0x8] sm:$0xff pattern:$0x73625140]  ;;  %v1092_v52 = vld [vmem:[%s1368_s1 + $0x110] sm:$0xff]  ;;  %v361_v1 = vadd.f32 %v1118_v61, %v360_v0 }
  0x1a   : > { %721 = vmatpush.bf16.msra.mxu2 %v1078_v15  ;;  %v392_v40 = vld.sshfl [vmem:[#allocation1] sm:$0xff pattern:$0x73625140]  ;;  %v394_v44 = vld.sshfl [vmem:[#allocation1 + $0x10] sm:$0xff pattern:$0x73625140] }
  0x1b   : > { %734 = vmatpush.bf16.msra.mxu3 %v1086_v16  ;;  %v395_v45 = vld.sshfl [vmem:[#allocation1 + $0x18] sm:$0xff pattern:$0x73625140]  ;;  %v1103_v47 = vld [vmem:[%s1368_s1 + $0x168] sm:$0xff]  ;;  %v1094_v48 = vld [vmem:[%s1368_s1 + $0x120] sm:$0xff]  ;;  %v363_v2 = vsel %vm362_vm1, %v1118_v61, %v361_v1 }
  0x1c   : > { %696 = vmatpush.bf16.msra.mxu0 %v1061_v18  ;;  %v1102_v49 = vld [vmem:[%s1368_s1 + $0x160] sm:$0xff]  ;;  %v1100_v53 = vld [vmem:[%s1368_s1 + $0x150] sm:$0xff]  ;;  %v1091_v54 = vld [vmem:[%s1368_s1 + $0x108] sm:$0xff] }
  0x1d   : > { %709 = vmatpush.bf16.msra.mxu1 %v1069_v19  ;;  %v1099_v55 = vld [vmem:[%s1368_s1 + $0x148] sm:$0xff]  ;;  %v1090_v56 = vld [vmem:[%s1368_s1 + $0x100] sm:$0xff] }
  0x1e   : > { %722 = vmatpush.bf16.msra.mxu2 %v1077_v22  ;;  %v1098_v57 = vld [vmem:[%s1368_s1 + $0x140] sm:$0xff]  ;;  %v397_v59 = vld.sshfl [vmem:[#allocation1 + $0x28] sm:$0xff pattern:$0x73625140] }
  0x1f   : > { %735 = vmatpush.bf16.msra.mxu3 %v1085_v23  ;;  %v396_v58 = vld.sshfl [vmem:[#allocation1 + $0x20] sm:$0xff pattern:$0x73625140] }
  0x20   : > { %697 = vmatpush.bf16.msra.mxu0 %v1060_v25  ;;  %v386_v15 = vld [vmem:[%s1370_s3 + $0x1] sm:$0xf] }
  0x21   : > { %710 = vmatpush.bf16.msra.mxu1 %v1068_v26 }
  0x22   : > { %723 = vmatpush.bf16.msra.mxu2 %v1076_v27 }
  0x23   : > { %736 = vmatpush.bf16.msra.mxu3 %v1084_v28 }
  0x24   : > { %698 = vmatpush.bf16.msra.mxu0 %v1059_v30 }
  0x25   : > { %711 = vmatpush.bf16.msra.mxu1 %v1067_v31 }
  0x26   : > { %724 = vmatpush.bf16.msra.mxu2 %v1075_v32 }
  0x27   : > { %737 = vmatpush.bf16.msra.mxu3 %v1083_v33 }
  0x28   : > { %699 = vmatpush.bf16.msra.mxu0 %v1058_v34 }
  0x29   : > { %712 = vmatpush.bf16.msra.mxu1 %v1066_v35 }
  0x2a   : > { %725 = vmatpush.bf16.msra.mxu2 %v1074_v38  ;;  %v250_v38 = vld [vmem:[%s1371_s4] sm:$0x1] }
  0x2b   : > { %700 = vmatmul.bf16.vlgmr.msra.gmra.mxu0 %v392_v40  ;;  %738 = vmatpush.bf16.msra.mxu3 %v1082_v39 }
  0x2c   : > { %744 = vmatpush.bf16.msrb.mxu0 %v1097_v36  ;;  %713 = vmatmul.bf16.vlgmr.msra.gmra.mxu1 %v393_v41  ;;  %v251_v41 = vld [vmem:[%s1372_s5] sm:$0x1] }
  0x2d   : > { %757 = vmatpush.bf16.msrb.mxu1 %v1105_v37  ;;  %726 = vmatmul.bf16.vlgmr.msra.gmra.mxu2 %v394_v44  ;;  %v798_v60 = vperm.slane %v251_v41, 0 }
  0x2e   : > { %739 = vmatmul.bf16.vlgmr.msra.gmra.mxu3 %v395_v45 }
  0x30   : > { %745 = vmatpush.bf16.msrb.mxu0 %v1096_v42 }
  0x31   : > { %758 = vmatpush.bf16.msrb.mxu1 %v1104_v43 }
  0x34   : > { %746 = vmatpush.bf16.msrb.mxu0 %v1095_v46 }
  0x35   : > { %759 = vmatpush.bf16.msrb.mxu1 %v1103_v47 }
  0x38   : > { %747 = vmatpush.bf16.msrb.mxu0 %v1094_v48 }
  0x39   : > { %760 = vmatpush.bf16.msrb.mxu1 %v1102_v49 }
  0x3c   : > { %748 = vmatpush.bf16.msrb.mxu0 %v1093_v50 }
  0x3d   : > { %761 = vmatpush.bf16.msrb.mxu1 %v1101_v51 }
  0x40   : > { %749 = vmatpush.bf16.msrb.mxu0 %v1092_v52 }
  0x41   : > { %762 = vmatpush.bf16.msrb.mxu1 %v1100_v53 }
  0x44   : > { %750 = vmatpush.bf16.msrb.mxu0 %v1091_v54 }
  0x45   : > { %763 = vmatpush.bf16.msrb.mxu1 %v1099_v55 }
  0x48   : > { %751 = vmatpush.bf16.msrb.mxu0 %v1090_v56 }
  0x49   : > { %764 = vmatpush.bf16.msrb.mxu1 %v1098_v57 }
  0x4b   : > { %752 = vmatmul.bf16.vlgmr.msrb.gmra.mxu0 %v396_v58  ;;  %v794_v58 = vperm.slane %v250_v38, 0 }
  0x4c   : > { %765 = vmatmul.bf16.vlgmr.msrb.gmra.mxu1 %v397_v59 }
  0x8c   : > { %v356_v3 = vpop.xlane.xlu0 %355 }
  0x8d   : > { %v364_v4 = vmul.f32 %v363_v2, %v356_v3 }
  0x8f   : > { %v365_v5 = vsub.f32 %v1245_v21, %v364_v4 }
  0x91   : > { %v366_v6 = vmul.f32 %v365_v5, %v365_v5 }
  0x93   : > { %v367_v7 = vsel %vm353_vm0, %v366_v6, 0.0 }
  0x94   : > { %368 = vadd.xlane.f32.xlu1 %v367_v7 }
  0xa8   : > { %v701_v8 = vpop.f32.mrf.mxu0 }
  0xa9   : > { %v714_v9 = vpop.f32.mrf.mxu1  ;;  %v702_v16 = vadd.f32 %v701_v8, %v386_v15 }
  0xab   : > { %v715_v19 = vadd.f32 %v714_v9, %v702_v16 }
  0xb0   : > { %v703_v11 = vpop.f32.mrf.mxu0  ;;  %v727_v13 = vpop.f32.mrf.mxu2 }
  0xb1   : > { %v716_v12 = vpop.f32.mrf.mxu1  ;;  %v740_v14 = vpop.f32.mrf.mxu3  ;;  %v728_v20 = vadd.f32 %v727_v13, %v715_v19 }
  0xb3   : > { %v741_v21 = vadd.f32 %v740_v14, %v728_v20 }
  0xb8   : > { %v729_v17 = vpop.f32.mrf.mxu2 }
  0xb9   : > { %v742_v18 = vpop.f32.mrf.mxu3 }
  0xc8   : > { %v753_v22 = vpop.f32.mrf.mxu0 }
  0xc9   : > { %v766_v23 = vpop.f32.mrf.mxu1  ;;  %v754_v24 = vadd.f32 %v753_v22, %v741_v21 }
  0xcb   : > { %v767_v25 = vadd.f32 %v766_v23, %v754_v24 }
  0xcd   : > { %v771_v26 = vsel %vm770_vm3, %v767_v25, 0.0 }
  0xce   : > { %772 = vadd.xlane.f32.xlu0 %v771_v26 }
  0xd0   : > { %v755_v27 = vpop.f32.mrf.mxu0 }
  0xd1   : > { %v768_v28 = vpop.f32.mrf.mxu1 }
 0x107   : > { %v369_v29 = vpop.xlane.xlu1 %368 }
 0x108   : > { %v370_v30 = vmul.f32 %v369_v29, %v363_v2 }
 0x10a   : > { %v371_v31 = vadd.f32 1e-05, %v370_v30 }
 0x10c   : > { %1119 = vrsqrt.f32 %v371_v31  ;;  %vm378_vm4 = vweird.f32 %v371_v31 }
 0x112   : > { %v1120_v32 = vpop.eup %1119 }
 0x113   : > { %v373_v33 = vmul.f32 %v1120_v32, %v371_v31  ;;  %vm379_vm5 = vweird.f32 %v1120_v32 }
 0x114   : > { %vm380_vm6 = vmor %vm378_vm4, %vm379_vm5 }
 0x115   : > { %v374_v34 = vmul.f32 %v1120_v32, %v373_v33 }
 0x117   : > { %v375_v35 = vmul.f32 0.5, %v374_v34 }
 0x119   : > { %v376_v36 = vsub.f32 1.5, %v375_v35 }
 0x11b   : > { %v377_v37 = vmul.f32 %v1120_v32, %v376_v36 }
 0x11d   : > { %v381_v39 = vsel %vm380_vm6, %v1120_v32, %v377_v37 }
 0x11e   : > { %v382_v40 = vmul.f32 %v381_v39, %v365_v5 }
 0x120   : > { %v383_v42 = vmul.f32 %v382_v40, %v250_v38 }
 0x122   : > { %v384_v43 = vadd.f32 %v383_v42, %v251_v41 }
 0x124   : > { %385 = vst.msk [vmem:[%s1346_s19] sm:$0x1] %vm353_vm0, %v384_v43 }
 0x141   : > { %v773_v44 = vpop.xlane.xlu0 %772 }
 0x142   : > { %v774_v45 = vmul.f32 %v773_v44, %v363_v2 }
 0x144   : > { %v775_v46 = vsub.f32 %v767_v25, %v774_v45 }
 0x146   : > { %v776_v47 = vmul.f32 %v775_v46, %v775_v46 }
 0x148   : > { %v777_v48 = vsel %vm770_vm3, %v776_v47, 0.0 }
 0x149   : > { %778 = vadd.xlane.f32.xlu1 %v777_v48 }
 0x1bc   : > { %v779_v49 = vpop.xlane.xlu1 %778 }
 0x1bd   : > { %v780_v50 = vmul.f32 %v779_v49, %v363_v2 }
 0x1bf   : > { %v781_v51 = vadd.f32 1e-05, %v780_v50 }
 0x1c1   : > { %1121 = vrsqrt.f32 %v781_v51  ;;  %vm788_vm8 = vweird.f32 %v781_v51 }
 0x1c7   : > { %v1122_v52 = vpop.eup %1121 }
 0x1c8   : > { %v783_v53 = vmul.f32 %v1122_v52, %v781_v51  ;;  %vm789_vm7 = vweird.f32 %v1122_v52 }
 0x1c9   : > { %vm790_vm9 = vmor %vm788_vm8, %vm789_vm7 }
 0x1ca   : > { %v784_v54 = vmul.f32 %v1122_v52, %v783_v53 }
 0x1cc   : > { %v785_v55 = vmul.f32 0.5, %v784_v54 }
 0x1ce   : > { %v786_v56 = vsub.f32 1.5, %v785_v55 }
 0x1d0   : > { %v787_v57 = vmul.f32 %v1122_v52, %v786_v56 }
 0x1d2   : > { %v791_v59 = vsel %vm790_vm9, %v1122_v52, %v787_v57 }
 0x1d3   : > { %v792_v61 = vmul.f32 %v791_v59, %v775_v46 }
 0x1d5   : > { %v796_v62 = vmul.f32 %v794_v58, %v792_v61 }
 0x1d7   : > { %v800_v63 = vadd.f32 %v798_v60, %v796_v62 }
 0x1d9   : > { %801 = vst.msk [vmem:[%s1346_s19 + $0x1] sm:$0xf] %vm770_vm3, %v800_v63 }
 0x1da PF: > { %s16_s21 = sadd.s32 1, %s1129_s21  }
 0x1db   : > { %p13_p4 = scmp.ge.s32.totalorder %s16_s21, 4  }
 0x1dd   :  { %15 = sbr.rel (!%p13_p4) target bundleno = 1 (0x1), region = 75 }

// kernel: _lambda_.4
= control target key start
LH: loop header
LB: loop body
LE: loop exit
PB: predicated region body
PF: predicated region fallthrough
CT: control target
= control target key end

     0   :  { %s2215_s25 = smov 0   ;;  %s2217_s26 = smov 0   ;;  %s2574_s0 = inlined_call_operand.vmem [shape: f32[2,8,64], index: 0, kind: input, shape index: {}, may-alias: {0,13}]   ;;  %s2575_s1 = inlined_call_operand.vmem [shape: f32[2,1,64], index: 1, kind: input, shape index: {}]   ;;  %s2576_s2 = inlined_call_operand.vmem [shape: f32[2,1,64], index: 2, kind: input, shape index: {}]   ;;  %s2577_s3 = inlined_call_operand.vmem [shape: bf16[2,64,192], index: 3, kind: input, shape index: {}]   ;;  %s2578_s4 = inlined_call_operand.vmem [shape: f32[2,1,192], index: 4, kind: input, shape index: {}]   ;;  %s2579_s5 = inlined_call_operand.vmem [shape: bf16[2,64,64], index: 5, kind: input, shape index: {}]   ;;  %s2580_s6 = inlined_call_operand.vmem [shape: f32[2,1,64], index: 6, kind: input, shape index: {}]   ;;  %s2581_s7 = inlined_call_operand.vmem [shape: f32[2,1,64], index: 7, kind: input, shape index: {}]   ;;  %s2582_s8 = inlined_call_operand.vmem [shape: f32[2,1,64], index: 8, kind: input, shape index: {}]   ;;  %s2583_s9 = inlined_call_operand.vmem [shape: bf16[2,64,256], index: 9, kind: input, shape index: {}]   ;;  %s2584_s10 = inlined_call_operand.vmem [shape: f32[2,1,256], index: 10, kind: input, shape index: {}]   ;;  %s2585_s11 = inlined_call_operand.vmem [shape: bf16[2,256,64], index: 11, kind: input, shape index: {}]   ;;  %s2586_s12 = inlined_call_operand.vmem [shape: f32[2,1,64], index: 12, kind: input, shape index: {}]   ;;  %s2587_s13 = inlined_call_operand.vmem [shape: f32[2,8,64], index: 13, kind: output, shape index: {}, may-alias: {0,13}]  }
   0x1   :  { %2590 = sst [smem:[#allocation6_spill]] %s2575_s1  ;;  %s2219_s27 = smov 0  }
   0x2   :  { %2591 = sst [smem:[#allocation7_spill]] %s2576_s2 }
   0x3   :  { %2592 = sst [smem:[#allocation8_spill]] %s2577_s3 }
   0x4   :  { %2593 = sst [smem:[#allocation9_spill]] %s2578_s4 }
   0x5   :  { %2594 = sst [smem:[#allocation10_spill]] %s2580_s6 }
   0x6 LB: > { %2595 = sst [smem:[#allocation2_spill]] %s2133_s26  ;;  %s32_s28 = sadd.s32 1, %s2133_s26  ;;  %s2137_s27 = sphi %s2219_s27, %s23_s27   ;;  %s2133_s26 = sphi %s2217_s26, %s2616_s26   ;;  %s2129_s25 = sphi %s2215_s25, %s2615_s25  }
   0x7   : > { %2596 = sst [smem:[#allocation3_spill]] %s2137_s27  ;;  %p1794_p0 = scmp.ge.s32.totalorder %s2137_s27, 1 }
   0x8   : > { %p33_p1 = scmp.ge.s32.totalorder %s32_s28, 2  ;;  %p506_p2 = scmp.lt.s32.totalorder %s2137_s27, 3 }
   0xa   : > { %s2618_s28 = smov (%p33_p1, %s32_s28), 0  ;;  %p507_p3 = pnand %p1794_p0, %p506_p2 }
   0xb   : > { %2597 = sst [smem:[#allocation4_spill]] %s2618_s28 }
   0xc   : > { %510 = sbr.rel (%p507_p3) target bundleno = 2341 (0x925), region = 72 }
  0x11   : > { %p602_p4 = scmp.lt.s32.totalorder %s2129_s25, 1  ;;  %s2600_s3 = sld [smem:[#allocation8_spill]] }
  0x12   : > { %s2601_s4 = sld [smem:[#allocation9_spill]]  ;;  %p1805_p5 = scmp.ne.s32.totalorder %s2129_s25, 0 }
  0x13   : > { %s2233_s29 = scalar_select %p602_p4, %s2129_s25, 1 }
  0x14   : > { %s2603_s6 = sld [smem:[#allocation10_spill]] }
  0x15   : > { %s1992_s19 = sshll.u32 %s2233_s29, 6  ;;  %s1797_s20 = sshll.u32 %s2233_s29, 1 }
  0x16   : > { %s1993_s28 = sshll.u32 %s2233_s29, 5  ;;  %s630_s24 = scalar_lea.vmem %s2582_s8, %s2233_s29 }
  0x17   : > { %s2248_s23 = scalar_lea.vmem %s2600_s3, %s1992_s19  ;;  %s2265_s18 = scalar_lea.vmem %s2579_s5, %s1993_s28 }
  0x18   : > { %s2253_s14 = scalar_lea.vmem %s2601_s4, %s1797_s20  ;;  %s1995_s28 = sshll.u32 %s2233_s29, 7 }
  0x19   : > { %2602 = sst [smem:[#allocation5_spill]] %s2253_s14  ;;  %s2278_s14 = scalar_lea.vmem %s2583_s9, %s1992_s19 }
  0x1a   : > { %s2260_s15 = scalar_lea.vmem %s2603_s6, %s2233_s29  ;;  %s2283_s6 = scalar_lea.vmem %s2584_s10, %s1797_s20 }
  0x1b   : > { %s2289_s2 = scalar_lea.vmem %s2585_s11, %s1995_s28  ;;  %s647_s1 = scalar_lea.vmem %s2586_s12, %s2233_s29 }
  0x1c   : > { %658 = sbr.rel (%p1805_p5) target bundleno = 36 (0x24), region = 76 }
  0x21   : > { %v659_v0 = vld [vmem:[%s2574_s0] sm:$0xff]  ;;  %vm661_vm0 = vcmask 523264   ;;  %v660_v1 = vld [vmem:[%s2574_s0 + $0x8] sm:$0xff] }
  0x22   : > { %662 = vst.msk [vmem:[%s2587_s13] sm:$0xff] %vm661_vm0, %v659_v0 }
  0x23   : > { %663 = vst.msk [vmem:[%s2587_s13 + $0x8] sm:$0xff] %vm661_vm0, %v660_v1 }
  0x24 PF: > { %vm668_vm1 = vcmask 523264   ;;  %v2139_v6 = vmov 64.0   ;;  %v1832_v23 = vld [vmem:[%s2248_s23 + $0x30] sm:$0xf]  ;;  %v2003_v24 = vld [vmem:[%s2248_s23 + $0x34] sm:$0xf0]  ;;  %s2609_s20 = scalar_lea.vmem %s2581_s7, %s2233_s29 }
  0x25   : > { %2073 = vrcp.f32 %v2139_v6  ;;  %v2002_v25 = vld [vmem:[%s2248_s23 + $0x34] sm:$0xf]  ;;  %v1833_v26 = vor.u32 %v2003_v24, %v1832_v23  ;;  %v1834_v27 = vld [vmem:[%s2248_s23 + $0x38] sm:$0xf0]  ;;  %v1824_v29 = vld [vmem:[%s2248_s23 + $0x20] sm:$0xf] }
  0x26   : > { %v1837_v28 = vor.u32 %v2002_v25, %v1834_v27  ;;  %v2001_v30 = vld [vmem:[%s2248_s23 + $0x24] sm:$0xf0]  ;;  %v2000_v31 = vld [vmem:[%s2248_s23 + $0x24] sm:$0xf]  ;;  %v1826_v33 = vld [vmem:[%s2248_s23 + $0x28] sm:$0xf0] }
  0x27   : > { %792 = vmatpush.bf16.msra.mxu0 %v1833_v26  ;;  %v1825_v32 = vor.u32 %v2001_v30, %v1824_v29  ;;  %v1829_v34 = vor.u32 %v2000_v31, %v1826_v33  ;;  %v1816_v35 = vld [vmem:[%s2248_s23 + $0x10] sm:$0xf]  ;;  %v1999_v36 = vld [vmem:[%s2248_s23 + $0x14] sm:$0xf0]  ;;  %v1998_v37 = vld [vmem:[%s2248_s23 + $0x14] sm:$0xf] }
  0x28   : > { %806 = vmatpush.bf16.msra.mxu1 %v1837_v28  ;;  %v1817_v38 = vor.u32 %v1999_v36, %v1816_v35  ;;  %v1818_v39 = vld [vmem:[%s2248_s23 + $0x18] sm:$0xf0]  ;;  %v1808_v41 = vld [vmem:[%s2248_s23] sm:$0xf]  ;;  %v1997_v42 = vld [vmem:[%s2248_s23 + $0x4] sm:$0xf0] }
  0x29   : > { %v2310_v2 = vld [vmem:[%s2587_s13] sm:$0xff]  ;;  %v1821_v40 = vor.u32 %v1998_v37, %v1818_v39  ;;  %v1809_v45 = vor.u32 %v1997_v42, %v1808_v41  ;;  %v1810_v46 = vld [vmem:[%s2248_s23 + $0x8] sm:$0xf0]  ;;  %s2605_s4 = sld [smem:[#allocation6_spill]]  ;;  %vm865_vm9 = vcmask 1043456   ;;  %s2140_s28 = smov 32  }
  0x2a   : > { %v669_v3 = vsel %vm668_vm1, %v2310_v2, 0.0  ;;  %v2317_v4 = vld [vmem:[%s2587_s13 + $0x8] sm:$0xff]  ;;  %v1996_v43 = vld [vmem:[%s2248_s23 + $0x4] sm:$0xf]  ;;  %s2604_s23 = sld [smem:[#allocation5_spill]]  ;;  %s2141_s25 = smov 96  }
  0x2b   : > { %670 = vadd.xlane.f32.xlu0 %v669_v3  ;;  %v672_v5 = vsel %vm668_vm1, %v2317_v4, 0.0  ;;  %v2074_v7 = vpop.eup %2073  ;;  %793 = vmatpush.bf16.msra.mxu0 %v1825_v32  ;;  %v1813_v48 = vor.u32 %v1996_v43, %v1810_v46  ;;  %s2607_s26 = sld [smem:[#allocation7_spill]]  ;;  %vm827_vm10 = vcmask 261120   ;;  %v818_v43 = vlaneseq  ;;  %s2143_s22 = smov 64  }
  0x2c   : > { %v676_v8 = vmul.f32 64.0, %v2074_v7  ;;  %vm680_vm2 = vweird.f32 %v2074_v7  ;;  %807 = vmatpush.bf16.msra.mxu1 %v1829_v34  ;;  %vm847_vm12 = vcmask 64512  }
  0x2e   : > { %v677_v9 = vsub.f32 1.0, %v676_v8 }
  0x2f   : > { %794 = vmatpush.bf16.msra.mxu0 %v1817_v38  ;;  %s2606_s19 = scalar_lea.vmem %s2605_s4, %s2233_s29 }
  0x30   : > { %v678_v10 = vmul.f32 %v2074_v7, %v677_v9  ;;  %808 = vmatpush.bf16.msra.mxu1 %v1821_v40  ;;  %v2066_v3 = vld [vmem:[%s2606_s19] ss:$0 sm:$0xff] }
  0x31   : > { %s2608_s27 = scalar_lea.vmem %s2607_s26, %s2233_s29 }
  0x32   : > { %v679_v11 = vadd.f32 %v2074_v7, %v678_v10  ;;  %v2067_v9 = vld [vmem:[%s2608_s27] ss:$0 sm:$0xff] }
  0x33   : > { %673 = vadd.xlane.f32.xlu0 %v672_v5  ;;  %795 = vmatpush.bf16.msra.mxu0 %v1809_v45  ;;  %v2142_v45 = vmov -1e+30  }
  0x34   : > { %v2321_v12 = vsel %vm680_vm2, %v2074_v7, %v679_v11  ;;  %809 = vmatpush.bf16.msra.mxu1 %v1813_v48 }
  0x9e   : > { %v671_v13 = vpop.xlane.xlu0 %670 }
  0x9f   : > { %v682_v14 = vmul.f32 %v2321_v12, %v671_v13 }
  0xa1   : > { %v2325_v15 = vsub.f32 %v2310_v2, %v682_v14 }
  0xa3   : > { %v686_v16 = vmul.f32 %v2325_v15, %v2325_v15 }
  0xa5   : > { %v688_v17 = vsel %vm668_vm1, %v686_v16, 0.0 }
  0xa6   : > { %689 = vadd.xlane.f32.xlu1 %v688_v17  ;;  %v674_v18 = vpop.xlane.xlu0 %673 }
  0xa7   : > { %v683_v19 = vmul.f32 %v2321_v12, %v674_v18 }
  0xa9   : > { %v2332_v20 = vsub.f32 %v2317_v4, %v683_v19 }
  0xab   : > { %v687_v21 = vmul.f32 %v2332_v20, %v2332_v20 }
  0xad   : > { %v691_v22 = vsel %vm668_vm1, %v687_v21, 0.0 }
  0xae   : > { %692 = vadd.xlane.f32.xlu1 %v691_v22 }
 0x119   : > { %v690_v44 = vpop.xlane.xlu1 %689 }
 0x11a   : > { %v694_v47 = vmul.f32 %v690_v44, %v2321_v12  ;;  %v819_v44 = vand.u32 127, %v818_v43 }
 0x11c   : > { %v696_v49 = vadd.f32 1e-05, %v694_v47  ;;  %vm820_vm11 = vcmp.lt.s32.totalorder %v819_v44, 5 }
 0x11d   : > { %v2390_v46 = vsel %vm820_vm11, 0.0, %v2142_v45 }
 0x11e   : > { %2075 = vrsqrt.f32 %v696_v49  ;;  %vm704_vm4 = vweird.f32 %v696_v49 }
 0x121   : > { %v693_v50 = vpop.xlane.xlu1 %692 }
 0x122   : > { %v695_v51 = vmul.f32 %v693_v50, %v2321_v12 }
 0x124   : > { %v2076_v52 = vpop.eup %2075  ;;  %v697_v53 = vadd.f32 1e-05, %v695_v51 }
 0x125   : > { %v699_v54 = vmul.f32 %v2076_v52, %v696_v49  ;;  %vm705_vm3 = vweird.f32 %v2076_v52 }
 0x126   : > { %2077 = vrsqrt.f32 %v697_v53  ;;  %vm706_vm5 = vmor %vm704_vm4, %vm705_vm3  ;;  %vm714_vm7 = vweird.f32 %v697_v53 }
 0x127   : > { %v700_v55 = vmul.f32 %v2076_v52, %v699_v54 }
 0x129   : > { %v701_v56 = vmul.f32 0.5, %v700_v55 }
 0x12b   : > { %v702_v57 = vsub.f32 1.5, %v701_v56  ;;  %v2007_v56 = vld [vmem:[%s2265_s18 + $0x18] sm:$0xff] }
 0x12c   : > { %v2078_v58 = vpop.eup %2077 }
 0x12d   : > { %v703_v59 = vmul.f32 %v2076_v52, %v702_v57  ;;  %v709_v60 = vmul.f32 %v2078_v58, %v697_v53  ;;  %vm715_vm6 = vweird.f32 %v2078_v58 }
 0x12e   : > { %vm716_vm8 = vmor %vm714_vm7, %vm715_vm6 }
 0x12f   : > { %v710_v61 = vmul.f32 %v2078_v58, %v709_v60  ;;  %v707_v62 = vsel %vm706_vm5, %v2076_v52, %v703_v59  ;;  %v2006_v59 = vld [vmem:[%s2265_s18 + $0x10] sm:$0xff] }
 0x130   : > { %v718_v1 = vmul.f32 %v707_v62, %v2325_v15  ;;  %v739_v15 = vld [vmem:[%s2604_s23] sm:$0x3] }
 0x131   : > { %v711_v63 = vmul.f32 0.5, %v710_v61  ;;  %v741_v16 = vperm.slane %v739_v15, 0  ;;  %v742_v17 = vperm.slane %v739_v15, 1 }
 0x132   : > { %v723_v8 = vmul.f32 %v2066_v3, %v718_v1 }
 0x133   : > { %v712_v0 = vsub.f32 1.5, %v711_v63 }
 0x134   : > { %v728_v11 = vadd.f32 %v2067_v9, %v723_v8 }
 0x135   : > { %v713_v5 = vmul.f32 %v2078_v58, %v712_v0 }
 0x137   : > { %v717_v6 = vsel %vm716_vm8, %v2078_v58, %v713_v5 }
 0x138   : > { %v719_v7 = vmul.f32 %v717_v6, %v2332_v20 }
 0x13a   : > { %v724_v10 = vmul.f32 %v2066_v3, %v719_v7 }
 0x13c   : > { %v729_v13 = vadd.f32 %v2067_v9, %v724_v10 }
 0x13e   : > { %v730_v14 = vpack.c.bf16 %v729_v13, %v728_v11 }
 0x140   : > { %1838 = vmatmul.msk.bf16.vlgmr.msra.gmra.mxu0 %vm668_vm1, %v730_v14  ;;  %1839 = vmatmul.msk.bf16.vlgmr.msra.gmra.mxu1 %vm668_vm1, %v730_v14 }
 0x1bd   : > { %v797_v18 = vpop.f32.mrf.mxu0  ;;  %v811_v19 = vpop.f32.mrf.mxu1 }
 0x1be   : > { %v798_v20 = vadd.f32 %v797_v18, %v741_v16  ;;  %v812_v21 = vadd.f32 %v811_v19, %v742_v17 }
 0x1c0   : > { %v2370_v22 = vpack.c.bf16 %v812_v21, %v798_v20 }
 0x1c2   : > { %v823_v23 = vunpack.c.l.b16 %v2370_v22  ;;  %v860_v24 = vunpack.c.h.b16 %v2370_v22 }
 0x1c4   : > { %v824_v25 = vpack.c.b16 %v823_v23, %v823_v23  ;;  %v861_v26 = vpack.c.b16 %v860_v24, %v860_v24  ;;  %v2005_v24 = vld [vmem:[%s2265_s18 + $0x8] sm:$0xff] }
 0x1c5   : > { %v799_v28 = vpop.f32.mrf.mxu0  ;;  %v813_v29 = vpop.f32.mrf.mxu1 }
 0x1c6   : > { %889 = vrot.lane.b32.xlu2 %v824_v25, %s2140_s28  ;;  %v867_v27 = vsel %vm865_vm9, %v861_v26, 0  ;;  %v800_v30 = vadd.f32 %v799_v28, %v741_v16  ;;  %v814_v31 = vadd.f32 %v813_v29, %v742_v17 }
 0x1c7   : > { %876 = vmatpush.bf16.msrb.mxu1 %v867_v27  ;;  %v2004_v27 = vld [vmem:[%s2265_s18] sm:$0xff] }
 0x1c8   : > { %v2376_v32 = vpack.c.bf16 %v814_v31, %v800_v30 }
 0x1ca   : > { %v1012_v33 = vunpack.c.l.b16 %v2376_v32  ;;  %v1047_v38 = vunpack.c.h.b16 %v2376_v32 }
 0x1cb   : > { %997 = vmatpush.bf16.msra.mxu1 %v2005_v24 }
 0x1cc   : > { %v1013_v34 = vpack.c.b16 %v1012_v33, %v1012_v33  ;;  %v2384_v39 = vpack.c.b16 %v1047_v38, %v1047_v38 }
 0x1ce   : > { %887 = vrot.lane.b32.xlu2 %v824_v25, %s2141_s25  ;;  %v1053_v42 = vsel %vm865_vm9, %v2384_v39, 0 }
 0x1cf   : > { %998 = vmatpush.bf16.msra.mxu1 %v2004_v27 }
 0x1d6   : > { %922 = vrot.lane.b32.xlu2 %v861_v26, %s2141_s25 }
 0x1de   : > { %1075 = vrot.lane.b32.xlu2 %v1013_v34, %s2140_s28 }
 0x1e6   : > { %1073 = vrot.lane.b32.xlu2 %v1013_v34, %s2141_s25 }
 0x220   : > { %v890_v35 = vpop.permute.xlu2 %889 }
 0x221   : > { %v895_v36 = vsel %vm827_vm10, %v890_v35, 0 }
 0x222   : > { %904 = vmatpush.bf16.xpose.msra.mxu3 %v895_v36 }
 0x228   : > { %v888_v37 = vpop.permute.xlu2 %887 }
 0x229   : > { %1842 = vmatmul.msk.bf16.vlgmr.msra.gmra.mxu3 %vm827_vm10, %v888_v37 }
 0x230   : > { %v923_v40 = vpop.permute.xlu2 %922 }
 0x231   : > { %v928_v41 = vsel %vm865_vm9, %v923_v40, 0 }
 0x232   : > { %937 = vmatpush.bf16.msra.mxu2 %v928_v41 }
 0x236   : > { %1062 = vmatpush.bf16.msrb.mxu2 %v1053_v42 }
 0x238   : > { %v1076_v60 = vpop.permute.xlu2 %1075 }
 0x239   : > { %v1081_v61 = vsel %vm827_vm10, %v1076_v60, 0 }
 0x240   : > { %v1074_v10 = vpop.permute.xlu2 %1073 }
 0x2ac   : > { %v906_v47 = vpop.f32.mrf.mxu3 }
 0x2ad   : > { %v907_v48 = vadd.f32 %v906_v47, %v2390_v46 }
 0x2af   : > { %v910_v49 = vsel %vm847_vm12, %v907_v48, -inf }
 0x2b0   : > { %911 = vmax.xlane.f32.xlu0 %v910_v49 }
 0x2b4   : > { %v908_v50 = vpop.f32.mrf.mxu3 }
 0x2c4   : > { %825 = vrot.lane.b32.xlu0 %v824_v25, %s2143_s22 }
 0x323   : > { %v912_v51 = vpop.xlane.xlu0 %911 }
 0x324   : > { %v913_v52 = vsub.f32 %v907_v48, %v912_v51 }
 0x326   : > { %v914_v53 = vmul.f32 1.442695, %v913_v52 }
 0x328   : > { %2079 = vpow2.f32 %v914_v53 }
 0x32e   : > { %v2080_v54 = vpop.eup %2079 }
 0x32f   : > { %v916_v55 = vsel %vm847_vm12, %v2080_v54, 0.0 }
 0x330   : > { %917 = vadd.xlane.f32.xlu1 %v916_v55 }
 0x336   : > { %v826_v57 = vpop.permute.xlu0 %825 }
 0x337   : > { %v832_v58 = vsel %vm827_vm10, %v826_v57, 0  ;;  %v2008_v57 = vld [vmem:[%s2265_s18] sm:$0xff] }
 0x338   : > { %841 = vmatpush.bf16.xpose.msrb.mxu0 %v832_v58  ;;  %v2011_v58 = vld [vmem:[%s2265_s18 + $0x18] sm:$0xff] }
 0x33f   : > { %1840 = vmatmul.msk.bf16.vlgmr.msrb.gmra.mxu0 %vm827_vm10, %v2370_v22 }
 0x340   : > { %969 = vmatpush.bf16.msra.mxu0 %v2007_v56  ;;  %v2009_v56 = vld [vmem:[%s2265_s18 + $0x8] sm:$0xff] }
 0x344   : > { %970 = vmatpush.bf16.msra.mxu0 %v2006_v59  ;;  %v2010_v59 = vld [vmem:[%s2265_s18 + $0x10] sm:$0xff] }
 0x348   : > { %1090 = vmatpush.bf16.xpose.msrb.mxu0 %v1081_v61 }
 0x349   : > { %1014 = vrot.lane.b32.xlu1 %v1013_v34, %s2143_s22 }
 0x3a3   : > { %v918_v62 = vpop.xlane.xlu1 %917 }
 0x3a4   : > { %2081 = vrcp.f32 %v918_v62 }
 0x3aa   : > { %v2082_v63 = vpop.eup %2081 }
 0x3ab   : > { %v920_v0 = vmul.f32 %v2082_v63, %v2080_v54  ;;  %v2068_v63 = vld [vmem:[%s2260_s15] ss:$0 sm:$0xff] }
 0x3ad   : > { %v921_v1 = vpack.c.bf16 %v920_v0, %v920_v0 }
 0x3af   : > { %1843 = vmatmul.msk.bf16.vlgmr.msra.gmra.mxu2 %vm847_vm12, %v921_v1 }
 0x3b0   : > { %1183 = vmatpush.bf16.msra.mxu2 %v2009_v56 }
 0x3b4   : > { %1184 = vmatpush.bf16.msra.mxu2 %v2008_v57 }
 0x3bb   : > { %v1015_v3 = vpop.permute.xlu1 %1014 }
 0x3bc   : > { %v843_v5 = vpop.f32.mrf.mxu0  ;;  %v1020_v6 = vsel %vm827_vm10, %v1015_v3, 0 }
 0x3bd   : > { %v844_v7 = vadd.f32 %v843_v5, %v2390_v46  ;;  %1029 = vmatpush.bf16.xpose.msrb.mxu3 %v1020_v6 }
 0x3bf   : > { %v848_v8 = vsel %vm847_vm12, %v844_v7, -inf }
 0x3c0   : > { %849 = vmax.xlane.f32.xlu2 %v848_v8 }
 0x3c4   : > { %v845_v9 = vpop.f32.mrf.mxu0  ;;  %1862 = vmatmul.msk.bf16.vlgmr.msrb.gmra.mxu3 %vm827_vm10, %v2376_v32 }
 0x3c5   : > { %1155 = vmatpush.bf16.msra.mxu3 %v2011_v58  ;;  %v1887_v58 = vld [vmem:[%s2278_s14] sm:$0xf] }
 0x3c9   : > { %1156 = vmatpush.bf16.msra.mxu3 %v2010_v59  ;;  %v2013_v59 = vld [vmem:[%s2278_s14 + $0x4] sm:$0xf0] }
 0x432   : > { %v939_v11 = vpop.f32.mrf.mxu2 }
 0x433   : > { %v943_v13 = vpack.c.bf16 %v939_v11, %v939_v11  ;;  %v850_v14 = vpop.xlane.xlu2 %849 }
 0x434   : > { %v851_v15 = vsub.f32 %v844_v7, %v850_v14 }
 0x435   : > { %1852 = vmatmul.msk.bf16.vlgmr.msra.gmra.mxu0 %vm827_vm10, %v943_v13 }
 0x436   : > { %v852_v16 = vmul.f32 1.442695, %v851_v15 }
 0x438   : > { %2083 = vpow2.f32 %v852_v16 }
 0x43a   : > { %v941_v17 = vpop.f32.mrf.mxu2 }
 0x43e   : > { %v2084_v18 = vpop.eup %2083 }
 0x43f   : > { %v854_v19 = vsel %vm847_vm12, %v2084_v18, 0.0 }
 0x440   : > { %855 = vadd.xlane.f32.xlu0 %v854_v19 }
 0x445   : > { %1864 = vmatmul.msk.bf16.vlgmr.msrb.gmra.mxu0 %vm827_vm10, %v1074_v10 }
 0x447   : > { %v1031_v20 = vpop.f32.mrf.mxu3 }
 0x448   : > { %v1032_v21 = vadd.f32 %v1031_v20, %v2390_v46 }
 0x44a   : > { %v1035_v22 = vsel %vm847_vm12, %v1032_v21, -inf }
 0x44b   : > { %1036 = vmax.xlane.f32.xlu1 %v1035_v22 }
 0x44f   : > { %v1033_v23 = vpop.f32.mrf.mxu3 }
 0x464   : > { %1108 = vrot.lane.b32.xlu1 %v2384_v39, %s2141_s25 }
 0x4b2   : > { %v972_v25 = vpop.f32.mrf.mxu0 }
 0x4b3   : > { %v856_v26 = vpop.xlane.xlu0 %855 }
 0x4b4   : > { %2085 = vrcp.f32 %v856_v26 }
 0x4ba   : > { %v2086_v28 = vpop.eup %2085  ;;  %v974_v29 = vpop.f32.mrf.mxu0 }
 0x4bb   : > { %v858_v30 = vmul.f32 %v2086_v28, %v2084_v18 }
 0x4bd   : > { %v859_v31 = vpack.c.bf16 %v858_v30, %v858_v30 }
 0x4be   : > { %v1037_v32 = vpop.xlane.xlu1 %1036 }
 0x4bf   : > { %v1038_v33 = vsub.f32 %v1032_v21, %v1037_v32  ;;  %1841 = vmatmul.msk.bf16.vlgmr.msrb.gmra.mxu1 %vm847_vm12, %v859_v31 }
 0x4c1   : > { %v1039_v34 = vmul.f32 1.442695, %v1038_v33 }
 0x4c2   : > { %v1092_v35 = vpop.f32.mrf.mxu0 }
 0x4c3   : > { %2087 = vpow2.f32 %v1039_v34  ;;  %v1093_v36 = vadd.f32 %v1092_v35, %v2390_v46 }
 0x4c5   : > { %v1096_v37 = vsel %vm847_vm12, %v1093_v36, -inf }
 0x4c6   : > { %1097 = vmax.xlane.f32.xlu2 %v1096_v37  ;;  %v1911_v37 = vld [vmem:[%s2278_s14 + $0x30] sm:$0xf] }
 0x4c9   : > { %v2088_v38 = vpop.eup %2087 }
 0x4ca   : > { %v1094_v39 = vpop.f32.mrf.mxu0  ;;  %v1041_v40 = vsel %vm847_vm12, %v2088_v38, 0.0 }
 0x4cb   : > { %1042 = vadd.xlane.f32.xlu0 %v1041_v40  ;;  %v2018_v39 = vld [vmem:[%s2278_s14 + $0x34] sm:$0xf] }
 0x4d6   : > { %v1109_v41 = vpop.permute.xlu1 %1108 }
 0x4d7   : > { %v1114_v42 = vsel %vm865_vm9, %v1109_v41, 0  ;;  %v1913_v41 = vld [vmem:[%s2278_s14 + $0x38] sm:$0xf0] }
 0x4d8   : > { %1123 = vmatpush.bf16.msrb.mxu1 %v1114_v42 }
 0x539   : > { %v1098_v44 = vpop.xlane.xlu2 %1097 }
 0x53a   : > { %v1099_v45 = vsub.f32 %v1093_v36, %v1098_v44  ;;  %v1916_v44 = vor.u32 %v2018_v39, %v1913_v41  ;;  %v2031_v41 = vld [vmem:[%s2289_s2 + $0x58] sm:$0xff] }
 0x53c   : > { %v1100_v47 = vmul.f32 1.442695, %v1099_v45  ;;  %v878_v48 = vpop.f32.mrf.mxu1  ;;  %v1903_v45 = vld [vmem:[%s2278_s14 + $0x20] sm:$0xf] }
 0x53d   : > { %v882_v49 = vpack.c.bf16 %v878_v48, %v878_v48  ;;  %v2016_v48 = vld [vmem:[%s2278_s14 + $0x24] sm:$0xf] }
 0x53e   : > { %2089 = vpow2.f32 %v1100_v47  ;;  %v1043_v46 = vpop.xlane.xlu0 %1042  ;;  %v2017_v47 = vld [vmem:[%s2278_s14 + $0x24] sm:$0xf0] }
 0x53f   : > { %2091 = vrcp.f32 %v1043_v46  ;;  %1861 = vmatmul.msk.bf16.vlgmr.msra.gmra.mxu1 %vm827_vm10, %v882_v49  ;;  %v1904_v49 = vor.u32 %v2017_v47, %v1903_v45  ;;  %v1905_v46 = vld [vmem:[%s2278_s14 + $0x28] sm:$0xf0] }
 0x540   : > { %1332 = vmatpush.bf16.msra.mxu1 %v1916_v44 }
 0x544   : > { %v2090_v50 = vpop.eup %2089  ;;  %v880_v51 = vpop.f32.mrf.mxu1 }
 0x545   : > { %v2092_v52 = vpop.eup %2091  ;;  %v1102_v53 = vsel %vm847_vm12, %v2090_v50, 0.0  ;;  %v1895_v51 = vld [vmem:[%s2278_s14 + $0x10] sm:$0xf] }
 0x546   : > { %v1045_v54 = vmul.f32 %v2092_v52, %v2088_v38  ;;  %1103 = vadd.xlane.f32.xlu2 %v1102_v53  ;;  %v2019_v38 = vld [vmem:[%s2278_s14 + $0x34] sm:$0xf0]  ;;  %v2014_v53 = vld [vmem:[%s2278_s14 + $0x14] sm:$0xf] }
 0x547   : > { %v1912_v40 = vor.u32 %v2019_v38, %v1911_v37  ;;  %v2015_v52 = vld [vmem:[%s2278_s14 + $0x14] sm:$0xf0] }
 0x548   : > { %v1046_v55 = vpack.c.bf16 %v1045_v54, %v1045_v54  ;;  %v1896_v54 = vor.u32 %v2015_v52, %v1895_v51 }
 0x549   : > { %1318 = vmatpush.bf16.msra.mxu0 %v1912_v40  ;;  %v2023_v40 = vld [vmem:[%s2289_s2 + $0x18] sm:$0xff] }
 0x54a   : > { %1863 = vmatmul.msk.bf16.vlgmr.msrb.gmra.mxu2 %vm847_vm12, %v1046_v55  ;;  %v1897_v55 = vld [vmem:[%s2278_s14 + $0x18] sm:$0xf0] }
 0x54b   : > { %v1900_v56 = vor.u32 %v2014_v53, %v1897_v55  ;;  %v2021_v53 = vld [vmem:[%s2289_s2 + $0x8] sm:$0xff] }
 0x54d   : > { %1319 = vmatpush.bf16.msra.mxu0 %v1904_v49  ;;  %v2030_v49 = vld [vmem:[%s2289_s2 + $0x50] sm:$0xff] }
 0x551   : > { %1320 = vmatpush.bf16.msra.mxu0 %v1896_v54  ;;  %v2029_v54 = vld [vmem:[%s2289_s2 + $0x48] sm:$0xff] }
 0x5b9   : > { %v1104_v60 = vpop.xlane.xlu2 %1103 }
 0x5ba   : > { %2093 = vrcp.f32 %v1104_v60  ;;  %v2012_v60 = vld [vmem:[%s2278_s14 + $0x4] sm:$0xf] }
 0x5bc   : > { %v1000_v61 = vpop.f32.mrf.mxu1 }
 0x5bd   : > { %v1001_v62 = vadd.f32 %v1000_v61, %v972_v25  ;;  %v2071_v25 = vld [vmem:[%s2260_s15] ss:$0 sm:$0xff]  ;;  %v1888_v61 = vor.u32 %v2013_v59, %v1887_v58 }
 0x5be   : > { %v2020_v59 = vld [vmem:[%s2289_s2] sm:$0xff] }
 0x5bf   : > { %v1004_v0 = vadd.f32 %v1001_v62, %v2310_v2  ;;  %v1889_v62 = vld [vmem:[%s2278_s14 + $0x8] sm:$0xf0]  ;;  %1321 = vmatpush.bf16.msra.mxu0 %v1888_v61 }
 0x5c0   : > { %v2094_v1 = vpop.eup %2093 }
 0x5c1   : > { %v1106_v3 = vmul.f32 %v2094_v1, %v2090_v50  ;;  %v1009_v5 = vadd.f32 %v2068_v63, %v1004_v0  ;;  %v1908_v50 = vor.u32 %v2016_v48, %v1905_v46  ;;  %v1892_v63 = vor.u32 %v2012_v60, %v1889_v62  ;;  %v2022_v48 = vld [vmem:[%s2289_s2 + $0x10] sm:$0xff]  ;;  %v2028_v60 = vld [vmem:[%s2289_s2 + $0x40] sm:$0xff] }
 0x5c3   : > { %v1107_v6 = vpack.c.bf16 %v1106_v3, %v1106_v3  ;;  %1010 = vst.msk [vmem:[%s2587_s13] sm:$0xff] %vm668_vm1, %v1009_v5  ;;  %1333 = vmatpush.bf16.msra.mxu1 %v1908_v50 }
 0x5c4   : > { %v1002_v7 = vpop.f32.mrf.mxu1 }
 0x5c5   : > { %1865 = vmatmul.msk.bf16.vlgmr.msrb.gmra.mxu1 %vm847_vm12, %v1107_v6 }
 0x5c7   : > { %1334 = vmatpush.bf16.msra.mxu1 %v1900_v56 }
 0x5ca   : > { %v2438_v8 = vld [vmem:[%s2587_s13] sm:$0xff] }
 0x5cb   : > { %v1202_v2 = vsel %vm668_vm1, %v2438_v8, 0.0  ;;  %1335 = vmatpush.bf16.msra.mxu1 %v1892_v63 }
 0x5cc   : > { %1203 = vadd.xlane.f32.xlu0 %v1202_v2 }
 0x5cd   : > { %v1064_v9 = vpop.f32.mrf.mxu2 }
 0x5ce   : > { %v1068_v10 = vpack.c.bf16 %v1064_v9, %v1064_v9 }
 0x5d0   : > { %1883 = vmatmul.msk.bf16.vlgmr.msra.gmra.mxu2 %vm827_vm10, %v1068_v10 }
 0x5d5   : > { %v1066_v11 = vpop.f32.mrf.mxu2 }
 0x63f   : > { %v1204_v13 = vpop.xlane.xlu0 %1203 }
 0x640   : > { %v1208_v14 = vmul.f32 %v1204_v13, %v2321_v12 }
 0x642   : > { %v2445_v15 = vsub.f32 %v2438_v8, %v1208_v14  ;;  %v1125_v16 = vpop.f32.mrf.mxu1 }
 0x643   : > { %v1129_v17 = vpack.c.bf16 %v1125_v16, %v1125_v16 }
 0x644   : > { %v1212_v18 = vmul.f32 %v2445_v15, %v2445_v15 }
 0x645   : > { %1874 = vmatmul.msk.bf16.vlgmr.msra.gmra.mxu3 %vm827_vm10, %v1129_v17 }
 0x646   : > { %v1214_v19 = vsel %vm668_vm1, %v1212_v18, 0.0 }
 0x647   : > { %1215 = vadd.xlane.f32.xlu0 %v1214_v19 }
 0x64a   : > { %v1127_v20 = vpop.f32.mrf.mxu1 }
 0x653   : > { %v1186_v21 = vpop.f32.mrf.mxu2 }
 0x65b   : > { %v1188_v22 = vpop.f32.mrf.mxu2 }
 0x6ba   : > { %v1216_v35 = vpop.xlane.xlu0 %1215 }
 0x6bb   : > { %v1220_v36 = vmul.f32 %v1216_v35, %v2321_v12  ;;  %v2032_v35 = vld [vmem:[%s2289_s2 + $0x60] sm:$0xff] }
 0x6bd   : > { %v1222_v42 = vadd.f32 1e-05, %v1220_v36 }
 0x6bf   : > { %2095 = vrsqrt.f32 %v1222_v42  ;;  %vm1230_vm14 = vweird.f32 %v1222_v42 }
 0x6c5   : > { %v2096_v57 = vpop.eup %2095 }
 0x6c6   : > { %v1225_v0 = vmul.f32 %v2096_v57, %v1222_v42  ;;  %vm1231_vm13 = vweird.f32 %v2096_v57 }
 0x6c7   : > { %vm1232_vm15 = vmor %vm1230_vm14, %vm1231_vm13 }
 0x6c8   : > { %v1158_v23 = vpop.f32.mrf.mxu3  ;;  %v1226_v1 = vmul.f32 %v2096_v57, %v1225_v0 }
 0x6c9   : > { %v1187_v24 = vadd.f32 %v1186_v21, %v1158_v23  ;;  %v2070_v21 = vld [vmem:[%s630_s24] ss:$0 sm:$0xff] }
 0x6ca   : > { %v1227_v7 = vmul.f32 0.5, %v1226_v1 }
 0x6cb   : > { %v1190_v26 = vadd.f32 %v1187_v24, %v2317_v4 }
 0x6cc   : > { %v1228_v2 = vsub.f32 1.5, %v1227_v7 }
 0x6cd   : > { %v1195_v27 = vadd.f32 %v2071_v25, %v1190_v26 }
 0x6ce   : > { %v1229_v10 = vmul.f32 %v2096_v57, %v1228_v2 }
 0x6cf   : > { %1884 = vst.msk [vmem:[%s2587_s13 + $0x8] sm:$0xff] %vm668_vm1, %v1195_v27  ;;  %v2027_v27 = vld [vmem:[%s2289_s2 + $0x38] sm:$0xff] }
 0x6d0   : > { %v1160_v28 = vpop.f32.mrf.mxu3  ;;  %v1233_v14 = vsel %vm1232_vm15, %v2096_v57, %v1229_v10  ;;  %1560 = vmatpush.bf16.msrb.mxu3 %v2027_v27 }
 0x6d1   : > { %v1244_v18 = vmul.f32 %v1233_v14, %v2445_v15  ;;  %v2035_v28 = vld [vmem:[%s2289_s2 + $0x78] sm:$0xff] }
 0x6d2   : > { %1574 = vmatpush.bf16.msrb.mxu2 %v2035_v28 }
 0x6d6   : > { %v2460_v29 = vld [vmem:[%s2587_s13 + $0x8] sm:$0xff] }
 0x6d7   : > { %v1205_v30 = vsel %vm668_vm1, %v2460_v29, 0.0 }
 0x6d8   : > { %1206 = vadd.xlane.f32.xlu2 %v1205_v30  ;;  %v2026_v30 = vld [vmem:[%s2289_s2 + $0x30] sm:$0xff] }
 0x6d9   : > { %1561 = vmatpush.bf16.msrb.mxu3 %v2026_v30 }
 0x74b   : > { %v1207_v4 = vpop.xlane.xlu2 %1206 }
 0x74c   : > { %v1209_v31 = vmul.f32 %v1207_v4, %v2321_v12  ;;  %v2034_v4 = vld [vmem:[%s2289_s2 + $0x70] sm:$0xff] }
 0x74d   : > { %1575 = vmatpush.bf16.msrb.mxu2 %v2034_v4 }
 0x74e   : > { %v2466_v32 = vsub.f32 %v2460_v29, %v1209_v31  ;;  %v2025_v31 = vld [vmem:[%s2289_s2 + $0x28] sm:$0xff] }
 0x74f   : > { %1562 = vmatpush.bf16.msrb.mxu3 %v2025_v31 }
 0x750   : > { %v1213_v33 = vmul.f32 %v2466_v32, %v2466_v32 }
 0x752   : > { %v1217_v34 = vsel %vm668_vm1, %v1213_v33, 0.0  ;;  %v1265_v33 = vld [vmem:[%s2283_s6] sm:$0x3] }
 0x753   : > { %1218 = vadd.xlane.f32.xlu2 %v1217_v34  ;;  %v2024_v34 = vld [vmem:[%s2289_s2 + $0x20] sm:$0xff]  ;;  %v1267_v36 = vperm.slane %v1265_v33, 0  ;;  %v1268_v37 = vperm.slane %v1265_v33, 1 }
 0x754   : > { %1563 = vmatpush.bf16.msrb.mxu3 %v2024_v34 }
 0x758   : > { %1564 = vmatpush.bf16.msrb.mxu3 %v2023_v40 }
 0x75c   : > { %1565 = vmatpush.bf16.msrb.mxu3 %v2022_v48 }
 0x760   : > { %1566 = vmatpush.bf16.msrb.mxu3 %v2021_v53 }
 0x764   : > { %1567 = vmatpush.bf16.msrb.mxu3 %v2020_v59 }
 0x7c6   : > { %v1219_v3 = vpop.xlane.xlu2 %1218 }
 0x7c7   : > { %v1221_v5 = vmul.f32 %v1219_v3, %v2321_v12  ;;  %v2069_v12 = vld [vmem:[%s2609_s20] ss:$0 sm:$0xff] }
 0x7c8   : > { %v1249_v22 = vmul.f32 %v2069_v12, %v1244_v18 }
 0x7c9   : > { %v1223_v6 = vadd.f32 1e-05, %v1221_v5 }
 0x7ca   : > { %v1254_v25 = vadd.f32 %v2070_v21, %v1249_v22 }
 0x7cb   : > { %2097 = vrsqrt.f32 %v1223_v6  ;;  %vm1240_vm2 = vweird.f32 %v1223_v6 }
 0x7d1   : > { %v2098_v9 = vpop.eup %2097 }
 0x7d2   : > { %v1235_v11 = vmul.f32 %v2098_v9, %v1223_v6  ;;  %vm1241_vm0 = vweird.f32 %v2098_v9 }
 0x7d3   : > { %vm1242_vm3 = vmor %vm1240_vm2, %vm1241_vm0 }
 0x7d4   : > { %v1236_v13 = vmul.f32 %v2098_v9, %v1235_v11 }
 0x7d6   : > { %v1237_v16 = vmul.f32 0.5, %v1236_v13 }
 0x7d8   : > { %v1238_v17 = vsub.f32 1.5, %v1237_v16 }
 0x7da   : > { %v1239_v19 = vmul.f32 %v2098_v9, %v1238_v17 }
 0x7dc   : > { %v1243_v20 = vsel %vm1242_vm3, %v2098_v9, %v1239_v19 }
 0x7dd   : > { %v1245_v23 = vmul.f32 %v1243_v20, %v2466_v32  ;;  %v2033_v32 = vld [vmem:[%s2289_s2 + $0x68] sm:$0xff] }
 0x7de   : > { %1576 = vmatpush.bf16.msrb.mxu2 %v2033_v32 }
 0x7df   : > { %v1250_v24 = vmul.f32 %v2069_v12, %v1245_v23 }
 0x7e1   : > { %v1255_v15 = vadd.f32 %v2070_v21, %v1250_v24 }
 0x7e2   : > { %1577 = vmatpush.bf16.msrb.mxu2 %v2032_v35 }
 0x7e3   : > { %v1256_v26 = vpack.c.bf16 %v1255_v15, %v1254_v25 }
 0x7e5   : > { %1917 = vmatmul.msk.bf16.vlgmr.msra.gmra.mxu0 %vm668_vm1, %v1256_v26  ;;  %1918 = vmatmul.msk.bf16.vlgmr.msra.gmra.mxu1 %vm668_vm1, %v1256_v26 }
 0x7e6   : > { %1578 = vmatpush.bf16.msrb.mxu2 %v2031_v41 }
 0x7ea   : > { %1579 = vmatpush.bf16.msrb.mxu2 %v2030_v49 }
 0x7ee   : > { %1580 = vmatpush.bf16.msrb.mxu2 %v2029_v54 }
 0x7f2   : > { %1581 = vmatpush.bf16.msrb.mxu2 %v2028_v60 }
 0x862   : > { %v1323_v38 = vpop.f32.mrf.mxu0  ;;  %v1337_v39 = vpop.f32.mrf.mxu1 }
 0x863   : > { %v2514_v42 = vadd.f32 %v1323_v38, %v1267_v36  ;;  %v2516_v44 = vadd.f32 %v1337_v39, %v1268_v37 }
 0x865   : > { %v1919_v45 = vmul.f32 -1.702, %v2514_v42  ;;  %v1920_v47 = vmul.f32 -1.702, %v2516_v44 }
 0x867   : > { %v1350_v46 = vmul.f32 1.442695, %v1919_v45  ;;  %v1352_v50 = vmul.f32 1.442695, %v1920_v47 }
 0x869   : > { %2099 = vpow2.f32 %v1350_v46 }
 0x86a   : > { %2101 = vpow2.f32 %v1352_v50  ;;  %v1325_v51 = vpop.f32.mrf.mxu0  ;;  %v1339_v52 = vpop.f32.mrf.mxu1 }
 0x86b   : > { %v2524_v55 = vadd.f32 %v1325_v51, %v1267_v36  ;;  %v2526_v56 = vadd.f32 %v1339_v52, %v1268_v37 }
 0x86d   : > { %v1921_v57 = vmul.f32 -1.702, %v2524_v55  ;;  %v1922_v58 = vmul.f32 -1.702, %v2526_v56 }
 0x86f   : > { %v2100_v61 = vpop.eup %2099  ;;  %v1354_v62 = vmul.f32 1.442695, %v1921_v57  ;;  %v1356_v1 = vmul.f32 1.442695, %v1922_v58 }
 0x870   : > { %v2102_v63 = vpop.eup %2101  ;;  %v1358_v0 = vadd.f32 1.0, %v2100_v61 }
 0x871   : > { %v1359_v3 = vadd.f32 1.0, %v2102_v63  ;;  %2103 = vpow2.f32 %v1354_v62 }
 0x872   : > { %2105 = vrcp.f32 %v1358_v0  ;;  %vm1367_vm5 = vweird.f32 %v1358_v0  ;;  %v1371_v21 = vand.u32 2147483647, %v1358_v0  ;;  %v1373_v22 = vand.u32 2147483648, %v1358_v0 }
 0x873   : > { %2107 = vrcp.f32 %v1359_v3  ;;  %vm1382_vm6 = vweird.f32 %v1359_v3  ;;  %v1386_v24 = vand.u32 2147483647, %v1359_v3  ;;  %v1388_v28 = vand.u32 2147483648, %v1359_v3 }
 0x874   : > { %2109 = vpow2.f32 %v1356_v1  ;;  %vm1372_vm10 = vcmp.eq.f32.partialorder %v1371_v21, 8.507059e+37  ;;  %v1374_v33 = vor.u32 1.1754944e-38, %v1373_v22 }
 0x875   : > { %v1389_v47 = vor.u32 1.1754944e-38, %v1388_v28  ;;  %vm1387_vm0 = vcmp.eq.f32.partialorder %v1386_v24, 8.507059e+37 }
 0x877   : > { %v2104_v5 = vpop.eup %2103 }
 0x878   : > { %v2106_v6 = vpop.eup %2105  ;;  %v1360_v7 = vadd.f32 1.0, %v2104_v5 }
 0x879   : > { %v2108_v2 = vpop.eup %2107  ;;  %v1363_v9 = vmul.f32 %v2106_v6, %v1358_v0  ;;  %vm1368_vm4 = vweird.f32 %v2106_v6 }
 0x87a   : > { %v2110_v10 = vpop.eup %2109  ;;  %v1378_v11 = vmul.f32 %v2108_v2, %v1359_v3  ;;  %2111 = vrcp.f32 %v1360_v7  ;;  %v1403_v15 = vand.u32 2147483648, %v1360_v7  ;;  %vm2532_vm7 = vmor %vm1367_vm5, %vm1368_vm4  ;;  %vm1383_vm8 = vweird.f32 %v2108_v2 }
 0x87b   : > { %v1364_v13 = vsub.f32 1.0, %v1363_v9  ;;  %v1361_v14 = vadd.f32 1.0, %v2110_v10  ;;  %v1401_v32 = vand.u32 2147483647, %v1360_v7  ;;  %vm1397_vm11 = vweird.f32 %v1360_v7  ;;  %vm2539_vm12 = vmor %vm1382_vm6, %vm1383_vm8 }
 0x87c   : > { %v1379_v16 = vsub.f32 1.0, %v1378_v11  ;;  %v1404_v37 = vor.u32 1.1754944e-38, %v1403_v15  ;;  %v2144_v3 = vmov 0.0  }
 0x87d   : > { %v1365_v17 = vmul.f32 %v2106_v6, %v1364_v13  ;;  %2113 = vrcp.f32 %v1361_v14  ;;  %v1416_v38 = vand.u32 2147483647, %v1361_v14  ;;  %v1418_v39 = vand.u32 2147483648, %v1361_v14 }
 0x87e   : > { %v1380_v18 = vmul.f32 %v2108_v2, %v1379_v16  ;;  %vm1402_vm15 = vcmp.eq.f32.partialorder %v1401_v32, 8.507059e+37  ;;  %vm1412_vm2 = vweird.f32 %v1361_v14 }
 0x87f   : > { %v1366_v19 = vadd.f32 %v2106_v6, %v1365_v17  ;;  %v1419_v53 = vor.u32 1.1754944e-38, %v1418_v39  ;;  %vm1417_vm4 = vcmp.eq.f32.partialorder %v1416_v38, 8.507059e+37 }
 0x880   : > { %v2112_v12 = vpop.eup %2111  ;;  %v1381_v27 = vadd.f32 %v2108_v2, %v1380_v18 }
 0x881   : > { %v1393_v20 = vmul.f32 %v2112_v12, %v1360_v7  ;;  %v1370_v4 = vsel %vm2532_vm7, %v2106_v6, %v1366_v19  ;;  %vm1398_vm9 = vweird.f32 %v2112_v12 }
 0x882   : > { %v1375_v40 = vsel %vm1372_vm10, %v1374_v33, %v1370_v4  ;;  %v1385_v41 = vsel %vm2539_vm12, %v2108_v2, %v1381_v27  ;;  %vm1399_vm13 = vmor %vm1397_vm11, %vm1398_vm9 }
 0x883   : > { %v2114_v23 = vpop.eup %2113  ;;  %v1394_v25 = vsub.f32 1.0, %v1393_v20  ;;  %v1422_v50 = vmul.f32 %v1375_v40, %v2514_v42  ;;  %v1390_v51 = vsel %vm1387_vm0, %v1389_v47, %v1385_v41  ;;  %v2072_v42 = vld [vmem:[%s647_s1] ss:$0 sm:$0xff] }
 0x884   : > { %v1408_v30 = vmul.f32 %v2114_v23, %v1361_v14  ;;  %vm1413_vm14 = vweird.f32 %v2114_v23  ;;  %v1423_v59 = vmul.f32 %v1390_v51, %v2516_v44 }
 0x885   : > { %v1395_v31 = vmul.f32 %v2112_v12, %v1394_v25  ;;  %vm1414_vm3 = vmor %vm1412_vm2, %vm1413_vm14 }
 0x886   : > { %v1409_v34 = vsub.f32 1.0, %v1408_v30 }
 0x887   : > { %v1396_v36 = vadd.f32 %v2112_v12, %v1395_v31 }
 0x888   : > { %v1410_v45 = vmul.f32 %v2114_v23, %v1409_v34 }
 0x889   : > { %v1400_v48 = vsel %vm1399_vm13, %v2112_v12, %v1396_v36 }
 0x88a   : > { %v1405_v49 = vsel %vm1402_vm15, %v1404_v37, %v1400_v48  ;;  %v1411_v46 = vadd.f32 %v2114_v23, %v1410_v45 }
 0x88b   : > { %v1424_v52 = vmul.f32 %v1405_v49, %v2524_v55  ;;  %v1591_v55 = vshrl.u32 %v818_v43, 7 }
 0x88c   : > { %v1415_v54 = vsel %vm1414_vm3, %v2114_v23, %v1411_v46 }
 0x88d   : > { %v1426_v57 = vpack.c.bf16 %v1424_v52, %v1422_v50  ;;  %v1420_v58 = vsel %vm1417_vm4, %v1419_v53, %v1415_v54  ;;  %vm1592_vm5 = vcmp.lt.s32.totalorder %v1591_v55, 5 }
 0x88e   : > { %v1425_v60 = vmul.f32 %v1420_v58, %v2526_v56  ;;  %v1987_v5 = vsel %vm1592_vm5, 1.0, %v2144_v3 }
 0x88f   : > { %1568 = vmatmul.bf16.vlgmr.msrb.gmra.mxu3 %v1426_v57 }
 0x890   : > { %v1427_v61 = vpack.c.bf16 %v1425_v60, %v1423_v59 }
 0x892   : > { %1582 = vmatmul.bf16.vlgmr.msrb.gmra.mxu2 %v1427_v61 }
 0x912   : > { %v1569_v62 = vpop.f32.mrf.mxu3 }
 0x913   : > { %v1570_v63 = vadd.f32 %v2072_v42, %v1569_v62 }
 0x915   : > { %v1583_v0 = vpop.f32.mrf.mxu2 }
 0x916   : > { %v1584_v1 = vadd.f32 %v1583_v0, %v1570_v63 }
 0x918   : > { %v1588_v44 = vadd.f32 %v1584_v1, %v2438_v8 }
 0x91a   : > { %v1595_v56 = vmul.f32 %v1987_v5, %v1588_v44  ;;  %v1571_v6 = vpop.f32.mrf.mxu3 }
 0x91b   : > { %v1572_v7 = vadd.f32 %v2072_v42, %v1571_v6 }
 0x91c   : > { %1597 = vst.msk [vmem:[%s2587_s13] sm:$0xff] %vm668_vm1, %v1595_v56 }
 0x91d   : > { %v1585_v2 = vpop.f32.mrf.mxu2 }
 0x91e   : > { %v1586_v9 = vadd.f32 %v1585_v2, %v1572_v7 }
 0x920   : > { %v1589_v43 = vadd.f32 %v1586_v9, %v2460_v29 }
 0x922   : > { %v1596_v10 = vmul.f32 %v1987_v5, %v1589_v43 }
 0x924   : > { %1598 = vst.msk [vmem:[%s2587_s13 + $0x8] sm:$0xff] %vm668_vm1, %v1596_v10 }
 0x925 PF: > { %s2614_s28 = sld [smem:[#allocation3_spill]] }
 0x926   : > { %s2615_s25 = sld [smem:[#allocation2_spill]] }
 0x927   : > { %s2616_s26 = sld [smem:[#allocation4_spill]] }
 0x92b   : > { %s23_s27 = sadd.s32 1, %s2614_s28  }
 0x92c   : > { %p20_p6 = scmp.ge.s32.totalorder %s23_s27, 4  }
 0x92e   :  { %22 = sbr.rel (!%p20_p6) target bundleno = 6 (0x6), region = 143 }

</bundles_post_ra>
